<compile_context>
chip_gen: v7x
topology: tpu7x:2x2x1
jax: 0.10.0
libtpu: 0.0.40
codegen_flags: <defaults>
</compile_context>

<pallas_src>
import functools

import jax
import jax.numpy as jnp
from jax.experimental import pallas as pl
from jax.experimental.pallas import tpu as pltpu


def _round_up(n, m):
    return ((n + m - 1) // m) * m


def _gru_linear_kernel(x_ref, w_ih_ref, w_hh_ref, b_ih_ref, b_hh_ref,
                       w_lin_ref, b_lin_ref,
                       out_ref, hn_ref, pred_ref,
                       gi_ref, *, seq_len, b_pad, h_pad):
    """Shapes (padded):
      x_ref:     (S*Bp, Ip)        w_ih_ref: (Ip, 3*Hp)    w_hh_ref: (Hp, 3*Hp)
      b_ih_ref:  (1, 3*Hp)         b_hh_ref: (1, 3*Hp)
      w_lin_ref: (Hp, Op)          b_lin_ref:(1, Op)
      out_ref:   (S*Bp, Hp)        hn_ref:   (Bp, Hp)      pred_ref: (S*Bp, Op)
      gi_ref:    VMEM scratch (S*Bp, 3*Hp)
    """
    # ---- Phase 1: input projection for ALL timesteps, one big MXU matmul. ----
    gi_ref[...] = (
        jnp.dot(x_ref[...], w_ih_ref[...], preferred_element_type=jnp.float32)
        + b_ih_ref[...]
    )

    # Hoisted loop invariants (loaded once, reused every step).
    w_hh = w_hh_ref[...]
    b_hh = b_hh_ref[...]

    # ---- Phase 2: sequential GRU recurrence (PyTorch gate order r, z, n). ----
    def step(t, h_prev):
        row = pl.multiple_of(t * b_pad, b_pad)
        gi_t = gi_ref[pl.ds(row, b_pad), :]                       # (Bp, 3*Hp)
        gh = jnp.dot(h_prev, w_hh, preferred_element_type=jnp.float32) + b_hh
        r = jax.nn.sigmoid(gi_t[:, 0:h_pad] + gh[:, 0:h_pad])
        z = jax.nn.sigmoid(gi_t[:, h_pad:2 * h_pad] + gh[:, h_pad:2 * h_pad])
        n = jnp.tanh(gi_t[:, 2 * h_pad:3 * h_pad]
                     + r * gh[:, 2 * h_pad:3 * h_pad])
        h_new = (1.0 - z) * n + z * h_prev
        out_ref[pl.ds(row, b_pad), :] = h_new.astype(out_ref.dtype)
        return h_new

    h0 = jnp.zeros((b_pad, h_pad), jnp.float32)
    h_last = jax.lax.fori_loop(0, seq_len, step, h0, unroll=True)
    hn_ref[...] = h_last.astype(hn_ref.dtype)

    # ---- Phase 3: Linear head over ALL timesteps, one lane-dense matmul. ----
    pred_ref[...] = (
        jnp.dot(out_ref[...].astype(jnp.float32), w_lin_ref[...],
                preferred_element_type=jnp.float32)
        + b_lin_ref[...]
    ).astype(pred_ref.dtype)


def rnn_model_forward(x, params):
    """x: (S, B, I) float32.  Returns (pred, h_n, output) like PyTorch (+ output)."""
    S, B, I = x.shape
    H = params["w_hh_t"].shape[0]
    O = params["w_lin_t"].shape[1]

    Bp = _round_up(B, 8)        # sublane multiple
    Ip = _round_up(I, 128)      # lane multiples
    Hp = _round_up(H, 128)
    Op = _round_up(O, 128)

    f32 = jnp.float32

    # Pad x into a flat (S*Bp, Ip) slab; zero padding contributes nothing.
    x_pad = jnp.zeros((S, Bp, Ip), x.dtype).at[:, :B, :I].set(x)
    x_flat = x_pad.reshape(S * Bp, Ip)

    # Gate-aligned layout: column block [g*Hp, g*Hp+H) holds gate g. Padded
    # rows/cols are zero, so padded hidden lanes stay exactly zero through the
    # recurrence (sigmoid(0)=0.5 gates act only on zero state/input there).
    def pad_gates(w, rows, rows_pad):
        out = jnp.zeros((rows_pad, 3 * Hp), f32)
        for g in range(3):
            out = out.at[:rows, g * Hp:g * Hp + H].set(w[:, g * H:(g + 1) * H])
        return out

    w_ih_p = pad_gates(params["w_ih_t"], I, Ip)       # (Ip, 3*Hp)
    w_hh_p = pad_gates(params["w_hh_t"], H, Hp)       # (Hp, 3*Hp)
    b_ih_p = pad_gates(params["b_ih"], 1, 1)          # (1, 3*Hp)
    b_hh_p = pad_gates(params["b_hh"], 1, 1)          # (1, 3*Hp)
    w_lin_p = jnp.zeros((Hp, Op), f32).at[:H, :O].set(params["w_lin_t"])
    b_lin_p = jnp.zeros((1, Op), f32).at[:, :O].set(params["b_lin"])

    kernel = functools.partial(_gru_linear_kernel,
                               seq_len=S, b_pad=Bp, h_pad=Hp)

    vmem = pl.BlockSpec(memory_space=pltpu.MemorySpace.VMEM)
    out_flat, hn_pad, pred_flat = pl.pallas_call(
        kernel,
        out_shape=(
            jax.ShapeDtypeStruct((S * Bp, Hp), x.dtype),   # GRU outputs
            jax.ShapeDtypeStruct((Bp, Hp), x.dtype),       # h_n
            jax.ShapeDtypeStruct((S * Bp, Op), x.dtype),   # linear head
        ),
        in_specs=[vmem] * 7,
        out_specs=(vmem, vmem, vmem),
        scratch_shapes=[pltpu.VMEM((S * Bp, 3 * Hp), jnp.float32)],
    )(x_flat, w_ih_p, w_hh_p, b_ih_p, b_hh_p, w_lin_p, b_lin_p)

    output = out_flat.reshape(S, Bp, Hp)[:, :B, :H]
    h_n = hn_pad[None, :B, :H]
    pred = pred_flat.reshape(S, Bp, Op)[:, :B, :O]
    return pred, h_n, output


def gru_reference(x, params):
    """Pure-JAX reference (lax.scan) implementing the same PyTorch GRU + Linear."""
    H = params["w_hh_t"].shape[0]

    def step(h, x_t):
        gi = x_t @ params["w_ih_t"] + params["b_ih"]
        gh = h @ params["w_hh_t"] + params["b_hh"]
        r = jax.nn.sigmoid(gi[:, :H] + gh[:, :H])
        z = jax.nn.sigmoid(gi[:, H:2 * H] + gh[:, H:2 * H])
        n = jnp.tanh(gi[:, 2 * H:] + r * gh[:, 2 * H:])
        h_new = (1.0 - z) * n + z * h
        return h_new, h_new

    B = x.shape[1]
    h0 = jnp.zeros((B, H), jnp.float32)
    h_last, outs = jax.lax.scan(step, h0, x)
    pred = outs @ params["w_lin_t"] + params["b_lin"]
    return pred, h_last[None], outs


def init_params(key, input_size, hidden_size, num_outputs):
    """PyTorch-shaped params: GRU weight_ih_l0 (3H,I), weight_hh_l0 (3H,H),
    bias_ih/hh (3H,), Linear weight (O,H), bias (O,). Uniform(-1/sqrt(H), 1/sqrt(H))."""
    ks = jax.random.split(key, 6)
    bound = 1.0 / jnp.sqrt(hidden_size)
    u = lambda k, shape: jax.random.uniform(k, shape, jnp.float32, -bound, bound)
    w_ih = u(ks[0], (3 * hidden_size, input_size))
    w_hh = u(ks[1], (3 * hidden_size, hidden_size))
    b_ih = u(ks[2], (3 * hidden_size,))
    b_hh = u(ks[3], (3 * hidden_size,))
    w_lin = u(ks[4], (num_outputs, hidden_size))
    b_lin = u(ks[5], (num_outputs,))
    return {
        "w_ih_t": w_ih.T,                 # (I, 3H)
        "w_hh_t": w_hh.T,                 # (H, 3H)
        "b_ih": b_ih[None, :],            # (1, 3H)
        "b_hh": b_hh[None, :],            # (1, 3H)
        "w_lin_t": w_lin.T,               # (H, O)
        "b_lin": b_lin[None, :],          # (1, O)
    }


if __name__ == "__main__":
    SEQ, BATCH, INPUT, HIDDEN, NUM_OUT = 8, 4, 16, 32, 8

    key = jax.random.PRNGKey(0)
    kx, kp = jax.random.split(key)
    x = jax.random.normal(kx, (SEQ, BATCH, INPUT), jnp.float32)
    params = init_params(kp, INPUT, HIDDEN, NUM_OUT)

    pred, h_n, output = jax.jit(rnn_model_forward)(x, params)
    jax.block_until_ready((pred, h_n, output))

    pred_ref, hn_ref, out_ref = gru_reference(x, params)
    assert pred.shape == (SEQ, BATCH, NUM_OUT)
    assert h_n.shape == (1, BATCH, HIDDEN)
    assert jnp.allclose(pred, pred_ref, atol=1e-5, rtol=1e-5)
    assert jnp.allclose(h_n, hn_ref, atol=1e-5, rtol=1e-5)
    assert jnp.allclose(output, out_ref, atol=1e-5, rtol=1e-5)

    print("KERNEL_OK")
</pallas_src>

<mosaic_0001>
module attributes {stable_mosaic.version = 11 : i64} {
  func.func @_gru_linear_kernel(%arg0: memref<64x128xf32, #tpu.memory_space<vmem>>, %arg1: memref<128x384xf32, #tpu.memory_space<vmem>>, %arg2: memref<128x384xf32, #tpu.memory_space<vmem>>, %arg3: memref<1x384xf32, #tpu.memory_space<vmem>>, %arg4: memref<1x384xf32, #tpu.memory_space<vmem>>, %arg5: memref<128x128xf32, #tpu.memory_space<vmem>>, %arg6: memref<1x128xf32, #tpu.memory_space<vmem>>, %arg7: memref<64x128xf32, #tpu.memory_space<vmem>>, %arg8: memref<8x128xf32, #tpu.memory_space<vmem>>, %arg9: memref<64x128xf32, #tpu.memory_space<vmem>>, %arg10: memref<64x384xf32, #tpu.memory_space<vmem>>) attributes {dimension_semantics = [], scalar_prefetch = 0 : i64, scratch_operands = 1 : i64, tpu.core_type = #tpu.core_type<tc>} {
    %c0 = arith.constant 0 : index
    %c0_0 = arith.constant 0 : index
    %0 = vector.load %arg0[%c0, %c0_0] : memref<64x128xf32, #tpu.memory_space<vmem>>, vector<64x128xf32>
    %c0_1 = arith.constant 0 : index
    %c0_2 = arith.constant 0 : index
    %1 = vector.load %arg1[%c0_1, %c0_2] : memref<128x384xf32, #tpu.memory_space<vmem>>, vector<128x384xf32>
    %cst = arith.constant dense<0.000000e+00> : vector<64x384xf32>
    %2 = tpu.matmul %0, %1, %cst {dimension_numbers = #tpu.dot_dimension_numbers<[1], [0], [0], [1], [0, 0, 1, 1], [], []>} : vector<64x128xf32>, vector<128x384xf32>, vector<64x384xf32> -> vector<64x384xf32>
    %c0_3 = arith.constant 0 : index
    %c0_4 = arith.constant 0 : index
    %3 = vector.load %arg3[%c0_3, %c0_4] : memref<1x384xf32, #tpu.memory_space<vmem>>, vector<1x384xf32>
    %4 = vector.broadcast %3 : vector<1x384xf32> to vector<64x384xf32>
    %5 = arith.addf %2, %4 : vector<64x384xf32>
    %c0_5 = arith.constant 0 : index
    %c0_6 = arith.constant 0 : index
    %6 = vector.load %arg10[%c0_5, %c0_6] : memref<64x384xf32, #tpu.memory_space<vmem>>, vector<64x384xf32>
    tpu.vector_store %arg10[%c0_5, %c0_6], %5 {strides = array<i32>} : memref<64x384xf32, #tpu.memory_space<vmem>>, vector<64x384xf32>,
    %c0_7 = arith.constant 0 : index
    %c0_8 = arith.constant 0 : index
    %7 = vector.load %arg2[%c0_7, %c0_8] : memref<128x384xf32, #tpu.memory_space<vmem>>, vector<128x384xf32>
    %c0_9 = arith.constant 0 : index
    %c0_10 = arith.constant 0 : index
    %8 = vector.load %arg4[%c0_9, %c0_10] : memref<1x384xf32, #tpu.memory_space<vmem>>, vector<1x384xf32>
    %cst_11 = arith.constant 0.000000e+00 : f32
    %9 = vector.broadcast %cst_11 : f32 to vector<8x128xf32>
    %c0_i32 = arith.constant 0 : i32
    %c8_i32 = arith.constant 8 : i32
    %10 = arith.muli %c0_i32, %c8_i32 : i32
    %11 = tpu.assume_multiple %10, 8 : i32
    %12 = arith.index_cast %11 : i32 to index
    %c0_12 = arith.constant 0 : index
    %13 = vector.load %arg10[%12, %c0_12] : memref<64x384xf32, #tpu.memory_space<vmem>>, vector<8x384xf32>
    %cst_13 = arith.constant dense<0.000000e+00> : vector<8x384xf32>
    %14 = tpu.matmul %9, %7, %cst_13 {dimension_numbers = #tpu.dot_dimension_numbers<[1], [0], [0], [1], [0, 0, 1, 1], [], []>} : vector<8x128xf32>, vector<128x384xf32>, vector<8x384xf32> -> vector<8x384xf32>
    %15 = vector.broadcast %8 : vector<1x384xf32> to vector<8x384xf32>
    %16 = arith.addf %14, %15 : vector<8x384xf32>
    %17 = vector.extract_strided_slice %13 {offsets = [0, 0], sizes = [8, 128], strides = [1, 1]} : vector<8x384xf32> to vector<8x128xf32>
    %18 = vector.extract_strided_slice %16 {offsets = [0, 0], sizes = [8, 128], strides = [1, 1]} : vector<8x384xf32> to vector<8x128xf32>
    %19 = arith.addf %17, %18 : vector<8x128xf32>
    %20 = arith.negf %19 : vector<8x128xf32>
    %21 = math.exp %20 : vector<8x128xf32>
    %cst_14 = arith.constant 1.000000e+00 : f32
    %22 = vector.broadcast %cst_14 : f32 to vector<8x128xf32>
    %23 = arith.addf %22, %21 : vector<8x128xf32>
    %24 = arith.divf %22, %23 : vector<8x128xf32>
    %25 = vector.extract_strided_slice %13 {offsets = [0, 128], sizes = [8, 128], strides = [1, 1]} : vector<8x384xf32> to vector<8x128xf32>
    %26 = vector.extract_strided_slice %16 {offsets = [0, 128], sizes = [8, 128], strides = [1, 1]} : vector<8x384xf32> to vector<8x128xf32>
    %27 = arith.addf %25, %26 : vector<8x128xf32>
    %28 = arith.negf %27 : vector<8x128xf32>
    %29 = math.exp %28 : vector<8x128xf32>
    %cst_15 = arith.constant 1.000000e+00 : f32
    %30 = vector.broadcast %cst_15 : f32 to vector<8x128xf32>
    %31 = arith.addf %30, %29 : vector<8x128xf32>
    %32 = arith.divf %30, %31 : vector<8x128xf32>
    %33 = vector.extract_strided_slice %13 {offsets = [0, 256], sizes = [8, 128], strides = [1, 1]} : vector<8x384xf32> to vector<8x128xf32>
    %34 = vector.extract_strided_slice %16 {offsets = [0, 256], sizes = [8, 128], strides = [1, 1]} : vector<8x384xf32> to vector<8x128xf32>
    %35 = arith.mulf %24, %34 : vector<8x128xf32>
    %36 = arith.addf %33, %35 : vector<8x128xf32>
    %37 = math.tanh %36 : vector<8x128xf32>
    %cst_16 = arith.constant 1.000000e+00 : f32
    %38 = vector.broadcast %cst_16 : f32 to vector<8x128xf32>
    %39 = arith.subf %38, %32 : vector<8x128xf32>
    %40 = arith.mulf %39, %37 : vector<8x128xf32>
    %41 = arith.mulf %32, %9 : vector<8x128xf32>
    %42 = arith.addf %40, %41 : vector<8x128xf32>
    %43 = arith.index_cast %11 : i32 to index
    %c0_17 = arith.constant 0 : index
    %44 = vector.load %arg7[%43, %c0_17] : memref<64x128xf32, #tpu.memory_space<vmem>>, vector<8x128xf32>
    tpu.vector_store %arg7[%43, %c0_17], %42 {strides = array<i32>} : memref<64x128xf32, #tpu.memory_space<vmem>>, vector<8x128xf32>,
    %c1_i32 = arith.constant 1 : i32
    %c8_i32_18 = arith.constant 8 : i32
    %45 = arith.muli %c1_i32, %c8_i32_18 : i32
    %46 = tpu.assume_multiple %45, 8 : i32
    %47 = arith.index_cast %46 : i32 to index
    %c0_19 = arith.constant 0 : index
    %48 = vector.load %arg10[%47, %c0_19] : memref<64x384xf32, #tpu.memory_space<vmem>>, vector<8x384xf32>
    %cst_20 = arith.constant dense<0.000000e+00> : vector<8x384xf32>
    %49 = tpu.matmul %42, %7, %cst_20 {dimension_numbers = #tpu.dot_dimension_numbers<[1], [0], [0], [1], [0, 0, 1, 1], [], []>} : vector<8x128xf32>, vector<128x384xf32>, vector<8x384xf32> -> vector<8x384xf32>
    %50 = vector.broadcast %8 : vector<1x384xf32> to vector<8x384xf32>
    %51 = arith.addf %49, %50 : vector<8x384xf32>
    %52 = vector.extract_strided_slice %48 {offsets = [0, 0], sizes = [8, 128], strides = [1, 1]} : vector<8x384xf32> to vector<8x128xf32>
    %53 = vector.extract_strided_slice %51 {offsets = [0, 0], sizes = [8, 128], strides = [1, 1]} : vector<8x384xf32> to vector<8x128xf32>
    %54 = arith.addf %52, %53 : vector<8x128xf32>
    %55 = arith.negf %54 : vector<8x128xf32>
    %56 = math.exp %55 : vector<8x128xf32>
    %cst_21 = arith.constant 1.000000e+00 : f32
    %57 = vector.broadcast %cst_21 : f32 to vector<8x128xf32>
    %58 = arith.addf %57, %56 : vector<8x128xf32>
    %59 = arith.divf %57, %58 : vector<8x128xf32>
    %60 = vector.extract_strided_slice %48 {offsets = [0, 128], sizes = [8, 128], strides = [1, 1]} : vector<8x384xf32> to vector<8x128xf32>
    %61 = vector.extract_strided_slice %51 {offsets = [0, 128], sizes = [8, 128], strides = [1, 1]} : vector<8x384xf32> to vector<8x128xf32>
    %62 = arith.addf %60, %61 : vector<8x128xf32>
    %63 = arith.negf %62 : vector<8x128xf32>
    %64 = math.exp %63 : vector<8x128xf32>
    %cst_22 = arith.constant 1.000000e+00 : f32
    %65 = vector.broadcast %cst_22 : f32 to vector<8x128xf32>
    %66 = arith.addf %65, %64 : vector<8x128xf32>
    %67 = arith.divf %65, %66 : vector<8x128xf32>
    %68 = vector.extract_strided_slice %48 {offsets = [0, 256], sizes = [8, 128], strides = [1, 1]} : vector<8x384xf32> to vector<8x128xf32>
    %69 = vector.extract_strided_slice %51 {offsets = [0, 256], sizes = [8, 128], strides = [1, 1]} : vector<8x384xf32> to vector<8x128xf32>
    %70 = arith.mulf %59, %69 : vector<8x128xf32>
    %71 = arith.addf %68, %70 : vector<8x128xf32>
    %72 = math.tanh %71 : vector<8x128xf32>
    %cst_23 = arith.constant 1.000000e+00 : f32
    %73 = vector.broadcast %cst_23 : f32 to vector<8x128xf32>
    %74 = arith.subf %73, %67 : vector<8x128xf32>
    %75 = arith.mulf %74, %72 : vector<8x128xf32>
    %76 = arith.mulf %67, %42 : vector<8x128xf32>
    %77 = arith.addf %75, %76 : vector<8x128xf32>
    %78 = arith.index_cast %46 : i32 to index
    %c0_24 = arith.constant 0 : index
    %79 = vector.load %arg7[%78, %c0_24] : memref<64x128xf32, #tpu.memory_space<vmem>>, vector<8x128xf32>
    tpu.vector_store %arg7[%78, %c0_24], %77 {strides = array<i32>} : memref<64x128xf32, #tpu.memory_space<vmem>>, vector<8x128xf32>,
    %c2_i32 = arith.constant 2 : i32
    %c8_i32_25 = arith.constant 8 : i32
    %80 = arith.muli %c2_i32, %c8_i32_25 : i32
    %81 = tpu.assume_multiple %80, 8 : i32
    %82 = arith.index_cast %81 : i32 to index
    %c0_26 = arith.constant 0 : index
    %83 = vector.load %arg10[%82, %c0_26] : memref<64x384xf32, #tpu.memory_space<vmem>>, vector<8x384xf32>
    %cst_27 = arith.constant dense<0.000000e+00> : vector<8x384xf32>
    %84 = tpu.matmul %77, %7, %cst_27 {dimension_numbers = #tpu.dot_dimension_numbers<[1], [0], [0], [1], [0, 0, 1, 1], [], []>} : vector<8x128xf32>, vector<128x384xf32>, vector<8x384xf32> -> vector<8x384xf32>
    %85 = vector.broadcast %8 : vector<1x384xf32> to vector<8x384xf32>
    %86 = arith.addf %84, %85 : vector<8x384xf32>
    %87 = vector.extract_strided_slice %83 {offsets = [0, 0], sizes = [8, 128], strides = [1, 1]} : vector<8x384xf32> to vector<8x128xf32>
    %88 = vector.extract_strided_slice %86 {offsets = [0, 0], sizes = [8, 128], strides = [1, 1]} : vector<8x384xf32> to vector<8x128xf32>
    %89 = arith.addf %87, %88 : vector<8x128xf32>
    %90 = arith.negf %89 : vector<8x128xf32>
    %91 = math.exp %90 : vector<8x128xf32>
    %cst_28 = arith.constant 1.000000e+00 : f32
    %92 = vector.broadcast %cst_28 : f32 to vector<8x128xf32>
    %93 = arith.addf %92, %91 : vector<8x128xf32>
    %94 = arith.divf %92, %93 : vector<8x128xf32>
    %95 = vector.extract_strided_slice %83 {offsets = [0, 128], sizes = [8, 128], strides = [1, 1]} : vector<8x384xf32> to vector<8x128xf32>
    %96 = vector.extract_strided_slice %86 {offsets = [0, 128], sizes = [8, 128], strides = [1, 1]} : vector<8x384xf32> to vector<8x128xf32>
    %97 = arith.addf %95, %96 : vector<8x128xf32>
    %98 = arith.negf %97 : vector<8x128xf32>
    %99 = math.exp %98 : vector<8x128xf32>
    %cst_29 = arith.constant 1.000000e+00 : f32
    %100 = vector.broadcast %cst_29 : f32 to vector<8x128xf32>
    %101 = arith.addf %100, %99 : vector<8x128xf32>
    %102 = arith.divf %100, %101 : vector<8x128xf32>
    %103 = vector.extract_strided_slice %83 {offsets = [0, 256], sizes = [8, 128], strides = [1, 1]} : vector<8x384xf32> to vector<8x128xf32>
    %104 = vector.extract_strided_slice %86 {offsets = [0, 256], sizes = [8, 128], strides = [1, 1]} : vector<8x384xf32> to vector<8x128xf32>
    %105 = arith.mulf %94, %104 : vector<8x128xf32>
    %106 = arith.addf %103, %105 : vector<8x128xf32>
    %107 = math.tanh %106 : vector<8x128xf32>
    %cst_30 = arith.constant 1.000000e+00 : f32
    %108 = vector.broadcast %cst_30 : f32 to vector<8x128xf32>
    %109 = arith.subf %108, %102 : vector<8x128xf32>
    %110 = arith.mulf %109, %107 : vector<8x128xf32>
    %111 = arith.mulf %102, %77 : vector<8x128xf32>
    %112 = arith.addf %110, %111 : vector<8x128xf32>
    %113 = arith.index_cast %81 : i32 to index
    %c0_31 = arith.constant 0 : index
    %114 = vector.load %arg7[%113, %c0_31] : memref<64x128xf32, #tpu.memory_space<vmem>>, vector<8x128xf32>
    tpu.vector_store %arg7[%113, %c0_31], %112 {strides = array<i32>} : memref<64x128xf32, #tpu.memory_space<vmem>>, vector<8x128xf32>,
    %c3_i32 = arith.constant 3 : i32
    %c8_i32_32 = arith.constant 8 : i32
    %115 = arith.muli %c3_i32, %c8_i32_32 : i32
    %116 = tpu.assume_multiple %115, 8 : i32
    %117 = arith.index_cast %116 : i32 to index
    %c0_33 = arith.constant 0 : index
    %118 = vector.load %arg10[%117, %c0_33] : memref<64x384xf32, #tpu.memory_space<vmem>>, vector<8x384xf32>
    %cst_34 = arith.constant dense<0.000000e+00> : vector<8x384xf32>
    %119 = tpu.matmul %112, %7, %cst_34 {dimension_numbers = #tpu.dot_dimension_numbers<[1], [0], [0], [1], [0, 0, 1, 1], [], []>} : vector<8x128xf32>, vector<128x384xf32>, vector<8x384xf32> -> vector<8x384xf32>
    %120 = vector.broadcast %8 : vector<1x384xf32> to vector<8x384xf32>
    %121 = arith.addf %119, %120 : vector<8x384xf32>
    %122 = vector.extract_strided_slice %118 {offsets = [0, 0], sizes = [8, 128], strides = [1, 1]} : vector<8x384xf32> to vector<8x128xf32>
    %123 = vector.extract_strided_slice %121 {offsets = [0, 0], sizes = [8, 128], strides = [1, 1]} : vector<8x384xf32> to vector<8x128xf32>
    %124 = arith.addf %122, %123 : vector<8x128xf32>
    %125 = arith.negf %124 : vector<8x128xf32>
    %126 = math.exp %125 : vector<8x128xf32>
    %cst_35 = arith.constant 1.000000e+00 : f32
    %127 = vector.broadcast %cst_35 : f32 to vector<8x128xf32>
    %128 = arith.addf %127, %126 : vector<8x128xf32>
    %129 = arith.divf %127, %128 : vector<8x128xf32>
    %130 = vector.extract_strided_slice %118 {offsets = [0, 128], sizes = [8, 128], strides = [1, 1]} : vector<8x384xf32> to vector<8x128xf32>
    %131 = vector.extract_strided_slice %121 {offsets = [0, 128], sizes = [8, 128], strides = [1, 1]} : vector<8x384xf32> to vector<8x128xf32>
    %132 = arith.addf %130, %131 : vector<8x128xf32>
    %133 = arith.negf %132 : vector<8x128xf32>
    %134 = math.exp %133 : vector<8x128xf32>
    %cst_36 = arith.constant 1.000000e+00 : f32
    %135 = vector.broadcast %cst_36 : f32 to vector<8x128xf32>
    %136 = arith.addf %135, %134 : vector<8x128xf32>
    %137 = arith.divf %135, %136 : vector<8x128xf32>
    %138 = vector.extract_strided_slice %118 {offsets = [0, 256], sizes = [8, 128], strides = [1, 1]} : vector<8x384xf32> to vector<8x128xf32>
    %139 = vector.extract_strided_slice %121 {offsets = [0, 256], sizes = [8, 128], strides = [1, 1]} : vector<8x384xf32> to vector<8x128xf32>
    %140 = arith.mulf %129, %139 : vector<8x128xf32>
    %141 = arith.addf %138, %140 : vector<8x128xf32>
    %142 = math.tanh %141 : vector<8x128xf32>
    %cst_37 = arith.constant 1.000000e+00 : f32
    %143 = vector.broadcast %cst_37 : f32 to vector<8x128xf32>
    %144 = arith.subf %143, %137 : vector<8x128xf32>
    %145 = arith.mulf %144, %142 : vector<8x128xf32>
    %146 = arith.mulf %137, %112 : vector<8x128xf32>
    %147 = arith.addf %145, %146 : vector<8x128xf32>
    %148 = arith.index_cast %116 : i32 to index
    %c0_38 = arith.constant 0 : index
    %149 = vector.load %arg7[%148, %c0_38] : memref<64x128xf32, #tpu.memory_space<vmem>>, vector<8x128xf32>
    tpu.vector_store %arg7[%148, %c0_38], %147 {strides = array<i32>} : memref<64x128xf32, #tpu.memory_space<vmem>>, vector<8x128xf32>,
    %c4_i32 = arith.constant 4 : i32
    %c8_i32_39 = arith.constant 8 : i32
    %150 = arith.muli %c4_i32, %c8_i32_39 : i32
    %151 = tpu.assume_multiple %150, 8 : i32
    %152 = arith.index_cast %151 : i32 to index
    %c0_40 = arith.constant 0 : index
    %153 = vector.load %arg10[%152, %c0_40] : memref<64x384xf32, #tpu.memory_space<vmem>>, vector<8x384xf32>
    %cst_41 = arith.constant dense<0.000000e+00> : vector<8x384xf32>
    %154 = tpu.matmul %147, %7, %cst_41 {dimension_numbers = #tpu.dot_dimension_numbers<[1], [0], [0], [1], [0, 0, 1, 1], [], []>} : vector<8x128xf32>, vector<128x384xf32>, vector<8x384xf32> -> vector<8x384xf32>
    %155 = vector.broadcast %8 : vector<1x384xf32> to vector<8x384xf32>
    %156 = arith.addf %154, %155 : vector<8x384xf32>
    %157 = vector.extract_strided_slice %153 {offsets = [0, 0], sizes = [8, 128], strides = [1, 1]} : vector<8x384xf32> to vector<8x128xf32>
    %158 = vector.extract_strided_slice %156 {offsets = [0, 0], sizes = [8, 128], strides = [1, 1]} : vector<8x384xf32> to vector<8x128xf32>
    %159 = arith.addf %157, %158 : vector<8x128xf32>
    %160 = arith.negf %159 : vector<8x128xf32>
    %161 = math.exp %160 : vector<8x128xf32>
    %cst_42 = arith.constant 1.000000e+00 : f32
    %162 = vector.broadcast %cst_42 : f32 to vector<8x128xf32>
    %163 = arith.addf %162, %161 : vector<8x128xf32>
    %164 = arith.divf %162, %163 : vector<8x128xf32>
    %165 = vector.extract_strided_slice %153 {offsets = [0, 128], sizes = [8, 128], strides = [1, 1]} : vector<8x384xf32> to vector<8x128xf32>
    %166 = vector.extract_strided_slice %156 {offsets = [0, 128], sizes = [8, 128], strides = [1, 1]} : vector<8x384xf32> to vector<8x128xf32>
    %167 = arith.addf %165, %166 : vector<8x128xf32>
    %168 = arith.negf %167 : vector<8x128xf32>
    %169 = math.exp %168 : vector<8x128xf32>
    %cst_43 = arith.constant 1.000000e+00 : f32
    %170 = vector.broadcast %cst_43 : f32 to vector<8x128xf32>
    %171 = arith.addf %170, %169 : vector<8x128xf32>
    %172 = arith.divf %170, %171 : vector<8x128xf32>
    %173 = vector.extract_strided_slice %153 {offsets = [0, 256], sizes = [8, 128], strides = [1, 1]} : vector<8x384xf32> to vector<8x128xf32>
    %174 = vector.extract_strided_slice %156 {offsets = [0, 256], sizes = [8, 128], strides = [1, 1]} : vector<8x384xf32> to vector<8x128xf32>
    %175 = arith.mulf %164, %174 : vector<8x128xf32>
    %176 = arith.addf %173, %175 : vector<8x128xf32>
    %177 = math.tanh %176 : vector<8x128xf32>
    %cst_44 = arith.constant 1.000000e+00 : f32
    %178 = vector.broadcast %cst_44 : f32 to vector<8x128xf32>
    %179 = arith.subf %178, %172 : vector<8x128xf32>
    %180 = arith.mulf %179, %177 : vector<8x128xf32>
    %181 = arith.mulf %172, %147 : vector<8x128xf32>
    %182 = arith.addf %180, %181 : vector<8x128xf32>
    %183 = arith.index_cast %151 : i32 to index
    %c0_45 = arith.constant 0 : index
    %184 = vector.load %arg7[%183, %c0_45] : memref<64x128xf32, #tpu.memory_space<vmem>>, vector<8x128xf32>
    tpu.vector_store %arg7[%183, %c0_45], %182 {strides = array<i32>} : memref<64x128xf32, #tpu.memory_space<vmem>>, vector<8x128xf32>,
    %c5_i32 = arith.constant 5 : i32
    %c8_i32_46 = arith.constant 8 : i32
    %185 = arith.muli %c5_i32, %c8_i32_46 : i32
    %186 = tpu.assume_multiple %185, 8 : i32
    %187 = arith.index_cast %186 : i32 to index
    %c0_47 = arith.constant 0 : index
    %188 = vector.load %arg10[%187, %c0_47] : memref<64x384xf32, #tpu.memory_space<vmem>>, vector<8x384xf32>
    %cst_48 = arith.constant dense<0.000000e+00> : vector<8x384xf32>
    %189 = tpu.matmul %182, %7, %cst_48 {dimension_numbers = #tpu.dot_dimension_numbers<[1], [0], [0], [1], [0, 0, 1, 1], [], []>} : vector<8x128xf32>, vector<128x384xf32>, vector<8x384xf32> -> vector<8x384xf32>
    %190 = vector.broadcast %8 : vector<1x384xf32> to vector<8x384xf32>
    %191 = arith.addf %189, %190 : vector<8x384xf32>
    %192 = vector.extract_strided_slice %188 {offsets = [0, 0], sizes = [8, 128], strides = [1, 1]} : vector<8x384xf32> to vector<8x128xf32>
    %193 = vector.extract_strided_slice %191 {offsets = [0, 0], sizes = [8, 128], strides = [1, 1]} : vector<8x384xf32> to vector<8x128xf32>
    %194 = arith.addf %192, %193 : vector<8x128xf32>
    %195 = arith.negf %194 : vector<8x128xf32>
    %196 = math.exp %195 : vector<8x128xf32>
    %cst_49 = arith.constant 1.000000e+00 : f32
    %197 = vector.broadcast %cst_49 : f32 to vector<8x128xf32>
    %198 = arith.addf %197, %196 : vector<8x128xf32>
    %199 = arith.divf %197, %198 : vector<8x128xf32>
    %200 = vector.extract_strided_slice %188 {offsets = [0, 128], sizes = [8, 128], strides = [1, 1]} : vector<8x384xf32> to vector<8x128xf32>
    %201 = vector.extract_strided_slice %191 {offsets = [0, 128], sizes = [8, 128], strides = [1, 1]} : vector<8x384xf32> to vector<8x128xf32>
    %202 = arith.addf %200, %201 : vector<8x128xf32>
    %203 = arith.negf %202 : vector<8x128xf32>
    %204 = math.exp %203 : vector<8x128xf32>
    %cst_50 = arith.constant 1.000000e+00 : f32
    %205 = vector.broadcast %cst_50 : f32 to vector<8x128xf32>
    %206 = arith.addf %205, %204 : vector<8x128xf32>
    %207 = arith.divf %205, %206 : vector<8x128xf32>
    %208 = vector.extract_strided_slice %188 {offsets = [0, 256], sizes = [8, 128], strides = [1, 1]} : vector<8x384xf32> to vector<8x128xf32>
    %209 = vector.extract_strided_slice %191 {offsets = [0, 256], sizes = [8, 128], strides = [1, 1]} : vector<8x384xf32> to vector<8x128xf32>
    %210 = arith.mulf %199, %209 : vector<8x128xf32>
    %211 = arith.addf %208, %210 : vector<8x128xf32>
    %212 = math.tanh %211 : vector<8x128xf32>
    %cst_51 = arith.constant 1.000000e+00 : f32
    %213 = vector.broadcast %cst_51 : f32 to vector<8x128xf32>
    %214 = arith.subf %213, %207 : vector<8x128xf32>
    %215 = arith.mulf %214, %212 : vector<8x128xf32>
    %216 = arith.mulf %207, %182 : vector<8x128xf32>
    %217 = arith.addf %215, %216 : vector<8x128xf32>
    %218 = arith.index_cast %186 : i32 to index
    %c0_52 = arith.constant 0 : index
    %219 = vector.load %arg7[%218, %c0_52] : memref<64x128xf32, #tpu.memory_space<vmem>>, vector<8x128xf32>
    tpu.vector_store %arg7[%218, %c0_52], %217 {strides = array<i32>} : memref<64x128xf32, #tpu.memory_space<vmem>>, vector<8x128xf32>,
    %c6_i32 = arith.constant 6 : i32
    %c8_i32_53 = arith.constant 8 : i32
    %220 = arith.muli %c6_i32, %c8_i32_53 : i32
    %221 = tpu.assume_multiple %220, 8 : i32
    %222 = arith.index_cast %221 : i32 to index
    %c0_54 = arith.constant 0 : index
    %223 = vector.load %arg10[%222, %c0_54] : memref<64x384xf32, #tpu.memory_space<vmem>>, vector<8x384xf32>
    %cst_55 = arith.constant dense<0.000000e+00> : vector<8x384xf32>
    %224 = tpu.matmul %217, %7, %cst_55 {dimension_numbers = #tpu.dot_dimension_numbers<[1], [0], [0], [1], [0, 0, 1, 1], [], []>} : vector<8x128xf32>, vector<128x384xf32>, vector<8x384xf32> -> vector<8x384xf32>
    %225 = vector.broadcast %8 : vector<1x384xf32> to vector<8x384xf32>
    %226 = arith.addf %224, %225 : vector<8x384xf32>
    %227 = vector.extract_strided_slice %223 {offsets = [0, 0], sizes = [8, 128], strides = [1, 1]} : vector<8x384xf32> to vector<8x128xf32>
    %228 = vector.extract_strided_slice %226 {offsets = [0, 0], sizes = [8, 128], strides = [1, 1]} : vector<8x384xf32> to vector<8x128xf32>
    %229 = arith.addf %227, %228 : vector<8x128xf32>
    %230 = arith.negf %229 : vector<8x128xf32>
    %231 = math.exp %230 : vector<8x128xf32>
    %cst_56 = arith.constant 1.000000e+00 : f32
    %232 = vector.broadcast %cst_56 : f32 to vector<8x128xf32>
    %233 = arith.addf %232, %231 : vector<8x128xf32>
    %234 = arith.divf %232, %233 : vector<8x128xf32>
    %235 = vector.extract_strided_slice %223 {offsets = [0, 128], sizes = [8, 128], strides = [1, 1]} : vector<8x384xf32> to vector<8x128xf32>
    %236 = vector.extract_strided_slice %226 {offsets = [0, 128], sizes = [8, 128], strides = [1, 1]} : vector<8x384xf32> to vector<8x128xf32>
    %237 = arith.addf %235, %236 : vector<8x128xf32>
    %238 = arith.negf %237 : vector<8x128xf32>
    %239 = math.exp %238 : vector<8x128xf32>
    %cst_57 = arith.constant 1.000000e+00 : f32
    %240 = vector.broadcast %cst_57 : f32 to vector<8x128xf32>
    %241 = arith.addf %240, %239 : vector<8x128xf32>
    %242 = arith.divf %240, %241 : vector<8x128xf32>
    %243 = vector.extract_strided_slice %223 {offsets = [0, 256], sizes = [8, 128], strides = [1, 1]} : vector<8x384xf32> to vector<8x128xf32>
    %244 = vector.extract_strided_slice %226 {offsets = [0, 256], sizes = [8, 128], strides = [1, 1]} : vector<8x384xf32> to vector<8x128xf32>
    %245 = arith.mulf %234, %244 : vector<8x128xf32>
    %246 = arith.addf %243, %245 : vector<8x128xf32>
    %247 = math.tanh %246 : vector<8x128xf32>
    %cst_58 = arith.constant 1.000000e+00 : f32
    %248 = vector.broadcast %cst_58 : f32 to vector<8x128xf32>
    %249 = arith.subf %248, %242 : vector<8x128xf32>
    %250 = arith.mulf %249, %247 : vector<8x128xf32>
    %251 = arith.mulf %242, %217 : vector<8x128xf32>
    %252 = arith.addf %250, %251 : vector<8x128xf32>
    %253 = arith.index_cast %221 : i32 to index
    %c0_59 = arith.constant 0 : index
    %254 = vector.load %arg7[%253, %c0_59] : memref<64x128xf32, #tpu.memory_space<vmem>>, vector<8x128xf32>
    tpu.vector_store %arg7[%253, %c0_59], %252 {strides = array<i32>} : memref<64x128xf32, #tpu.memory_space<vmem>>, vector<8x128xf32>,
    %c7_i32 = arith.constant 7 : i32
    %c8_i32_60 = arith.constant 8 : i32
    %255 = arith.muli %c7_i32, %c8_i32_60 : i32
    %256 = tpu.assume_multiple %255, 8 : i32
    %257 = arith.index_cast %256 : i32 to index
    %c0_61 = arith.constant 0 : index
    %258 = vector.load %arg10[%257, %c0_61] : memref<64x384xf32, #tpu.memory_space<vmem>>, vector<8x384xf32>
    %cst_62 = arith.constant dense<0.000000e+00> : vector<8x384xf32>
    %259 = tpu.matmul %252, %7, %cst_62 {dimension_numbers = #tpu.dot_dimension_numbers<[1], [0], [0], [1], [0, 0, 1, 1], [], []>} : vector<8x128xf32>, vector<128x384xf32>, vector<8x384xf32> -> vector<8x384xf32>
    %260 = vector.broadcast %8 : vector<1x384xf32> to vector<8x384xf32>
    %261 = arith.addf %259, %260 : vector<8x384xf32>
    %262 = vector.extract_strided_slice %258 {offsets = [0, 0], sizes = [8, 128], strides = [1, 1]} : vector<8x384xf32> to vector<8x128xf32>
    %263 = vector.extract_strided_slice %261 {offsets = [0, 0], sizes = [8, 128], strides = [1, 1]} : vector<8x384xf32> to vector<8x128xf32>
    %264 = arith.addf %262, %263 : vector<8x128xf32>
    %265 = arith.negf %264 : vector<8x128xf32>
    %266 = math.exp %265 : vector<8x128xf32>
    %cst_63 = arith.constant 1.000000e+00 : f32
    %267 = vector.broadcast %cst_63 : f32 to vector<8x128xf32>
    %268 = arith.addf %267, %266 : vector<8x128xf32>
    %269 = arith.divf %267, %268 : vector<8x128xf32>
    %270 = vector.extract_strided_slice %258 {offsets = [0, 128], sizes = [8, 128], strides = [1, 1]} : vector<8x384xf32> to vector<8x128xf32>
    %271 = vector.extract_strided_slice %261 {offsets = [0, 128], sizes = [8, 128], strides = [1, 1]} : vector<8x384xf32> to vector<8x128xf32>
    %272 = arith.addf %270, %271 : vector<8x128xf32>
    %273 = arith.negf %272 : vector<8x128xf32>
    %274 = math.exp %273 : vector<8x128xf32>
    %cst_64 = arith.constant 1.000000e+00 : f32
    %275 = vector.broadcast %cst_64 : f32 to vector<8x128xf32>
    %276 = arith.addf %275, %274 : vector<8x128xf32>
    %277 = arith.divf %275, %276 : vector<8x128xf32>
    %278 = vector.extract_strided_slice %258 {offsets = [0, 256], sizes = [8, 128], strides = [1, 1]} : vector<8x384xf32> to vector<8x128xf32>
    %279 = vector.extract_strided_slice %261 {offsets = [0, 256], sizes = [8, 128], strides = [1, 1]} : vector<8x384xf32> to vector<8x128xf32>
    %280 = arith.mulf %269, %279 : vector<8x128xf32>
    %281 = arith.addf %278, %280 : vector<8x128xf32>
    %282 = math.tanh %281 : vector<8x128xf32>
    %cst_65 = arith.constant 1.000000e+00 : f32
    %283 = vector.broadcast %cst_65 : f32 to vector<8x128xf32>
    %284 = arith.subf %283, %277 : vector<8x128xf32>
    %285 = arith.mulf %284, %282 : vector<8x128xf32>
    %286 = arith.mulf %277, %252 : vector<8x128xf32>
    %287 = arith.addf %285, %286 : vector<8x128xf32>
    %288 = arith.index_cast %256 : i32 to index
    %c0_66 = arith.constant 0 : index
    %289 = vector.load %arg7[%288, %c0_66] : memref<64x128xf32, #tpu.memory_space<vmem>>, vector<8x128xf32>
    tpu.vector_store %arg7[%288, %c0_66], %287 {strides = array<i32>} : memref<64x128xf32, #tpu.memory_space<vmem>>, vector<8x128xf32>,
    %c8_i32_67 = arith.constant 8 : i32
    %c0_68 = arith.constant 0 : index
    %c0_69 = arith.constant 0 : index
    %290 = vector.load %arg8[%c0_68, %c0_69] : memref<8x128xf32, #tpu.memory_space<vmem>>, vector<8x128xf32>
    tpu.vector_store %arg8[%c0_68, %c0_69], %287 {strides = array<i32>} : memref<8x128xf32, #tpu.memory_space<vmem>>, vector<8x128xf32>,
    %c0_70 = arith.constant 0 : index
    %c0_71 = arith.constant 0 : index
    %291 = vector.load %arg7[%c0_70, %c0_71] : memref<64x128xf32, #tpu.memory_space<vmem>>, vector<64x128xf32>
    %c0_72 = arith.constant 0 : index
    %c0_73 = arith.constant 0 : index
    %292 = vector.load %arg5[%c0_72, %c0_73] : memref<128x128xf32, #tpu.memory_space<vmem>>, vector<128x128xf32>
    %cst_74 = arith.constant dense<0.000000e+00> : vector<64x128xf32>
    %293 = tpu.matmul %291, %292, %cst_74 {dimension_numbers = #tpu.dot_dimension_numbers<[1], [0], [0], [1], [0, 0, 1, 1], [], []>} : vector<64x128xf32>, vector<128x128xf32>, vector<64x128xf32> -> vector<64x128xf32>
    %c0_75 = arith.constant 0 : index
    %c0_76 = arith.constant 0 : index
    %294 = vector.load %arg6[%c0_75, %c0_76] : memref<1x128xf32, #tpu.memory_space<vmem>>, vector<1x128xf32>
    %295 = vector.broadcast %294 : vector<1x128xf32> to vector<64x128xf32>
    %296 = arith.addf %293, %295 : vector<64x128xf32>
    %c0_77 = arith.constant 0 : index
    %c0_78 = arith.constant 0 : index
    %297 = vector.load %arg9[%c0_77, %c0_78] : memref<64x128xf32, #tpu.memory_space<vmem>>, vector<64x128xf32>
    tpu.vector_store %arg9[%c0_77, %c0_78], %296 {strides = array<i32>} : memref<64x128xf32, #tpu.memory_space<vmem>>, vector<64x128xf32>,
    return
  }
}

</mosaic_0001>

<bundles_post_ra>
// kernel: rnn_model_forward.1
= control target key start
LH: loop header
LB: loop body
LE: loop exit
PB: predicated region body
PF: predicated region fallthrough
CT: control target
= control target key end

     0   :  { %v4148_v3 = vmov 0.0   ;;  %vm3185_vm0 = vmmov 0   ;;  %s4138_s1 = inlined_call_operand.vmem [shape: f32[128,384], index: 1, kind: input, shape index: {}]   ;;  %s4139_s2 = inlined_call_operand.vmem [shape: f32[128,384], index: 2, kind: input, shape index: {}]   ;;  %s4140_s0 = inlined_call_operand.vmem [shape: f32[64,128], index: 0, kind: input, shape index: {}]   ;;  %s4141_s3 = inlined_call_operand.vmem [shape: f32[1,384], index: 3, kind: input, shape index: {}]   ;;  %s4142_s4 = inlined_call_operand.vmem [shape: f32[1,384], index: 4, kind: input, shape index: {}]   ;;  %s4143_s7 = inlined_call_operand.vmem [shape: f32[64,128], index: 7, kind: output, shape index: {0}]   ;;  %s4144_s5 = inlined_call_operand.vmem [shape: f32[128,128], index: 5, kind: input, shape index: {}]   ;;  %s4145_s6 = inlined_call_operand.vmem [shape: f32[1,128], index: 6, kind: input, shape index: {}]   ;;  %s4146_s9 = inlined_call_operand.vmem [shape: f32[64,128], index: 9, kind: output, shape index: {2}]   ;;  %s4147_s8 = inlined_call_operand.vmem [shape: f32[8,128], index: 8, kind: output, shape index: {1}]  }
   0x1   :  { %v38_v0 = vld [vmem:[%s4138_s1 + $0x8] sm:$0xff]  ;;  %v41_v1 = vld [vmem:[%s4138_s1 + $0x20] sm:$0xff]  ;;  %166 = vmatprep.mubr.f32.mxu1 %v4148_v3  ;;  %479 = vmatprep.mubr.f32.mxu0 %v4148_v3  ;;  %v40_v5 = vld [vmem:[%s4138_s1 + $0x18] sm:$0xff] }
   0x2   :  { %v37_v2 = vld [vmem:[%s4138_s1] sm:$0xff]  ;;  %v2508_v4 = vpack.c.bf16 %v41_v1, %v38_v0  ;;  %v44_v6 = vld [vmem:[%s4138_s1 + $0x38] sm:$0xff]  ;;  %v47_v7 = vld [vmem:[%s4138_s1 + $0x50] sm:$0xff] }
   0x3   :  { %v2510_v8 = vpack.c.bf16 %v40_v5, %v37_v2  ;;  %v2512_v9 = vpack.c.bf16 %v47_v7, %v44_v6  ;;  %v345_v10 = vld [vmem:[%s4139_s2 + $0x8] sm:$0xff]  ;;  %v348_v11 = vld [vmem:[%s4139_s2 + $0x20] sm:$0xff]  ;;  %v43_v12 = vld [vmem:[%s4138_s1 + $0x30] sm:$0xff] }
   0x4   :  { %2509 = vmatprep.subr.bf16.mxu1 %v2508_v4  ;;  %v3265_v13 = vpack.c.bf16 %v348_v11, %v345_v10  ;;  %v46_v14 = vld [vmem:[%s4138_s1 + $0x48] sm:$0xff]  ;;  %v344_v15 = vld [vmem:[%s4139_s2] sm:$0xff]  ;;  %v347_v16 = vld [vmem:[%s4139_s2 + $0x18] sm:$0xff] }
   0x5   :  { %2511 = vmatpush1.bf16.msra.mxu1 %v2510_v8  ;;  %v2514_v17 = vpack.c.bf16 %v46_v14, %v43_v12  ;;  %v3276_v18 = vpack.c.bf16 %v347_v16, %v344_v15  ;;  %v50_v19 = vld [vmem:[%s4138_s1 + $0x68] sm:$0xff]  ;;  %v53_v20 = vld [vmem:[%s4138_s1 + $0x80] sm:$0xff]  ;;  %v351_v21 = vld [vmem:[%s4139_s2 + $0x38] sm:$0xff] }
   0x6   :  { %2513 = vmatprep.subr.bf16.mxu1 %v2512_v9  ;;  %2573 = vmatprep.subr.bf16.mxu0 %v3265_v13  ;;  %v2516_v22 = vpack.c.bf16 %v53_v20, %v50_v19  ;;  %v354_v23 = vld [vmem:[%s4139_s2 + $0x50] sm:$0xff]  ;;  %v49_v24 = vld [vmem:[%s4138_s1 + $0x60] sm:$0xff]  ;;  %v52_v25 = vld [vmem:[%s4138_s1 + $0x78] sm:$0xff] }
   0x7   :  { %2575 = vmatpush1.bf16.msra.mxu0 %v3276_v18  ;;  %v3298_v26 = vpack.c.bf16 %v354_v23, %v351_v21  ;;  %v350_v27 = vld [vmem:[%s4139_s2 + $0x30] sm:$0xff]  ;;  %v353_v28 = vld [vmem:[%s4139_s2 + $0x48] sm:$0xff]  ;;  %v56_v29 = vld [vmem:[%s4138_s1 + $0x98] sm:$0xff]  ;;  %v2518_v34 = vpack.c.bf16 %v52_v25, %v49_v24 }
   0x8   :  { %v3309_v30 = vpack.c.bf16 %v353_v28, %v350_v27  ;;  %v59_v31 = vld [vmem:[%s4138_s1 + $0xb0] sm:$0xff]  ;;  %v357_v32 = vld [vmem:[%s4139_s2 + $0x68] sm:$0xff]  ;;  %v360_v33 = vld [vmem:[%s4139_s2 + $0x80] sm:$0xff] }
   0x9   :  { %2515 = vmatpush1.bf16.msra.mxu1 %v2514_v17  ;;  %2577 = vmatprep.subr.bf16.mxu0 %v3298_v26  ;;  %v3321_v35 = vpack.c.bf16 %v360_v33, %v357_v32  ;;  %v55_v36 = vld [vmem:[%s4138_s1 + $0x90] sm:$0xff]  ;;  %v356_v37 = vld [vmem:[%s4139_s2 + $0x60] sm:$0xff]  ;;  %v2520_v38 = vpack.c.bf16 %v59_v31, %v56_v29  ;;  %v58_v39 = vld [vmem:[%s4138_s1 + $0xa8] sm:$0xff] }
   0xa   :  { %2517 = vmatprep.subr.bf16.mxu1 %v2516_v22  ;;  %v359_v40 = vld [vmem:[%s4139_s2 + $0x78] sm:$0xff]  ;;  %v62_v41 = vld [vmem:[%s4138_s1 + $0xc8] sm:$0xff]  ;;  %v65_v43 = vld [vmem:[%s4138_s1 + $0xe0] sm:$0xff]  ;;  %v2522_v49 = vpack.c.bf16 %v58_v39, %v55_v36 }
   0xb   :  { %2579 = vmatpush1.bf16.msra.mxu0 %v3309_v30  ;;  %v3339_v42 = vpack.c.bf16 %v359_v40, %v356_v37  ;;  %v363_v44 = vld [vmem:[%s4139_s2 + $0x98] sm:$0xff]  ;;  %v366_v45 = vld [vmem:[%s4139_s2 + $0xb0] sm:$0xff]  ;;  %v365_v48 = vld [vmem:[%s4139_s2 + $0xa8] sm:$0xff]  ;;  %v2524_v51 = vpack.c.bf16 %v65_v43, %v62_v41 }
   0xc   :  { %2581 = vmatprep.subr.bf16.mxu0 %v3321_v35  ;;  %v3351_v46 = vpack.c.bf16 %v366_v45, %v363_v44  ;;  %v362_v47 = vld [vmem:[%s4139_s2 + $0x90] sm:$0xff]  ;;  %v369_v50 = vld [vmem:[%s4139_s2 + $0xc8] sm:$0xff]  ;;  %v61_v52 = vld [vmem:[%s4138_s1 + $0xc0] sm:$0xff] }
   0xd   :  { %2519 = vmatpush1.bf16.msra.mxu1 %v2518_v34  ;;  %v64_v53 = vld [vmem:[%s4138_s1 + $0xd8] sm:$0xff]  ;;  %v372_v54 = vld [vmem:[%s4139_s2 + $0xe0] sm:$0xff]  ;;  %v3372_v55 = vpack.c.bf16 %v365_v48, %v362_v47  ;;  %v71_v57 = vld [vmem:[%s4138_s1 + $0x110] sm:$0xff] }
   0xe   :  { %2521 = vmatprep.subr.bf16.mxu1 %v2520_v38  ;;  %v68_v56 = vld [vmem:[%s4138_s1 + $0xf8] sm:$0xff]  ;;  %v3381_v58 = vpack.c.bf16 %v372_v54, %v369_v50  ;;  %v368_v59 = vld [vmem:[%s4139_s2 + $0xc0] sm:$0xff]  ;;  %v2526_v61 = vpack.c.bf16 %v64_v53, %v61_v52  ;;  %v378_v63 = vld [vmem:[%s4139_s2 + $0x110] sm:$0xff] }
   0xf   :  { %2583 = vmatpush1.bf16.msra.mxu0 %v3339_v42  ;;  %v371_v60 = vld [vmem:[%s4139_s2 + $0xd8] sm:$0xff]  ;;  %v2528_v0 = vpack.c.bf16 %v71_v57, %v68_v56  ;;  %v67_v1 = vld [vmem:[%s4138_s1 + $0xf0] sm:$0xff]  ;;  %v70_v2 = vld [vmem:[%s4138_s1 + $0x108] sm:$0xff] }
  0x10   :  { %2585 = vmatprep.subr.bf16.mxu0 %v3351_v46  ;;  %v375_v62 = vld [vmem:[%s4139_s2 + $0xf8] sm:$0xff]  ;;  %v3402_v4 = vpack.c.bf16 %v371_v60, %v368_v59  ;;  %v74_v5 = vld [vmem:[%s4138_s1 + $0x128] sm:$0xff]  ;;  %v77_v6 = vld [vmem:[%s4138_s1 + $0x140] sm:$0xff]  ;;  %v2530_v10 = vpack.c.bf16 %v70_v2, %v67_v1 }
  0x11   :  { %2523 = vmatpush1.bf16.msra.mxu1 %v2522_v49  ;;  %v3411_v7 = vpack.c.bf16 %v378_v63, %v375_v62  ;;  %v374_v8 = vld [vmem:[%s4139_s2 + $0xf0] sm:$0xff]  ;;  %v377_v9 = vld [vmem:[%s4139_s2 + $0x108] sm:$0xff]  ;;  %v384_v12 = vld [vmem:[%s4139_s2 + $0x140] sm:$0xff]  ;;  %v2532_v14 = vpack.c.bf16 %v77_v6, %v74_v5 }
  0x12   :  { %2525 = vmatprep.subr.bf16.mxu1 %v2524_v51  ;;  %v381_v11 = vld [vmem:[%s4139_s2 + $0x128] sm:$0xff]  ;;  %v73_v15 = vld [vmem:[%s4138_s1 + $0x120] sm:$0xff]  ;;  %v76_v16 = vld [vmem:[%s4138_s1 + $0x138] sm:$0xff]  ;;  %v3432_v17 = vpack.c.bf16 %v377_v9, %v374_v8 }
  0x13   :  { %2587 = vmatpush1.bf16.msra.mxu0 %v3372_v55  ;;  %v80_v19 = vld [vmem:[%s4138_s1 + $0x158] sm:$0xff]  ;;  %v83_v20 = vld [vmem:[%s4138_s1 + $0x170] sm:$0xff]  ;;  %v3441_v21 = vpack.c.bf16 %v384_v12, %v381_v11  ;;  %v380_v22 = vld [vmem:[%s4139_s2 + $0x120] sm:$0xff]  ;;  %v2534_v24 = vpack.c.bf16 %v76_v16, %v73_v15 }
  0x14   :  { %2589 = vmatprep.subr.bf16.mxu0 %v3381_v58  ;;  %v383_v23 = vld [vmem:[%s4139_s2 + $0x138] sm:$0xff]  ;;  %v390_v27 = vld [vmem:[%s4139_s2 + $0x170] sm:$0xff]  ;;  %v2536_v28 = vpack.c.bf16 %v83_v20, %v80_v19  ;;  %v82_v31 = vld [vmem:[%s4138_s1 + $0x168] sm:$0xff]  ;;  %v4150_v20 = vmov 0.0|0.0  }
  0x15   :  { %2527 = vmatpush1.bf16.msra.mxu1 %v2526_v61  ;;  %v387_v25 = vld [vmem:[%s4139_s2 + $0x158] sm:$0xff]  ;;  %v79_v29 = vld [vmem:[%s4138_s1 + $0x150] sm:$0xff]  ;;  %v3462_v32 = vpack.c.bf16 %v383_v23, %v380_v22  ;;  %v42_v34 = vld [vmem:[%s4138_s1 + $0x28] sm:$0xff] }
  0x16   :  { %2529 = vmatprep.subr.bf16.mxu1 %v2528_v0  ;;  %v39_v33 = vld [vmem:[%s4138_s1 + $0x10] sm:$0xff]  ;;  %v3471_v36 = vpack.c.bf16 %v390_v27, %v387_v25  ;;  %v389_v38 = vld [vmem:[%s4139_s2 + $0x168] sm:$0xff]  ;;  %v2538_v39 = vpack.c.bf16 %v82_v31, %v79_v29  ;;  %v45_v43 = vld [vmem:[%s4138_s1 + $0x40] sm:$0xff] }
  0x17   :  { %2591 = vmatpush1.bf16.msra.mxu0 %v3402_v4  ;;  %v386_v37 = vld [vmem:[%s4139_s2 + $0x150] sm:$0xff]  ;;  %v2540_v40 = vpack.c.bf16 %v42_v34, %v39_v33  ;;  %v48_v44 = vld [vmem:[%s4138_s1 + $0x58] sm:$0xff]  ;;  %v3492_v45 = vld [vmem:[%s4140_s0] sm:$0xff] }
  0x18   :  { %2593 = vmatprep.subr.bf16.mxu0 %v3411_v7  ;;  %v3480_v41 = vpack.c.bf16 %v389_v38, %v386_v37  ;;  %v2544_v47 = vpack.c.bf16 %v48_v44, %v45_v43  ;;  %v51_v48 = vld [vmem:[%s4138_s1 + $0x70] sm:$0xff]  ;;  %v54_v49 = vld [vmem:[%s4138_s1 + $0x88] sm:$0xff]  ;;  %v57_v52 = vld [vmem:[%s4138_s1 + $0xa0] sm:$0xff] }
  0x19   :  { %2531 = vmatpush1.bf16.msra.mxu1 %v2530_v10  ;;  %v3507_v50 = vld [vmem:[%s4140_s0 + $0x8] sm:$0xff]  ;;  %v2548_v51 = vpack.c.bf16 %v54_v49, %v51_v48  ;;  %v60_v53 = vld [vmem:[%s4138_s1 + $0xb8] sm:$0xff]  ;;  %v3524_v54 = vld [vmem:[%s4140_s0 + $0x10] sm:$0xff] }
  0x1a   :  { %2533 = vmatprep.subr.bf16.mxu1 %v2532_v14  ;;  %v2552_v56 = vpack.c.bf16 %v60_v53, %v57_v52  ;;  %v63_v57 = vld [vmem:[%s4138_s1 + $0xd0] sm:$0xff]  ;;  %v66_v59 = vld [vmem:[%s4138_s1 + $0xe8] sm:$0xff]  ;;  %v32_v60 = vld [vmem:[%s4140_s0 + $0x18] sm:$0xff] }
  0x1b   :  { %2595 = vmatpush1.bf16.msra.mxu0 %v3432_v17  ;;  %v2556_v61 = vpack.c.bf16 %v66_v59, %v63_v57  ;;  %v69_v62 = vld [vmem:[%s4138_s1 + $0x100] sm:$0xff]  ;;  %v72_v63 = vld [vmem:[%s4138_s1 + $0x118] sm:$0xff]  ;;  %v75_v2 = vld [vmem:[%s4138_s1 + $0x130] sm:$0xff] }
  0x1c   :  { %2597 = vmatprep.subr.bf16.mxu0 %v3441_v21  ;;  %v33_v0 = vld [vmem:[%s4140_s0 + $0x20] sm:$0xff]  ;;  %v2560_v1 = vpack.c.bf16 %v72_v63, %v69_v62  ;;  %v78_v5 = vld [vmem:[%s4138_s1 + $0x148] sm:$0xff]  ;;  %v84_v10 = vld [vmem:[%s4138_s1 + $0x178] sm:$0xff] }
  0x1d   :  { %2535 = vmatpush1.bf16.msra.mxu1 %v2534_v24  ;;  %v34_v6 = vld [vmem:[%s4140_s0 + $0x28] sm:$0xff]  ;;  %v2564_v8 = vpack.c.bf16 %v78_v5, %v75_v2  ;;  %v81_v9 = vld [vmem:[%s4138_s1 + $0x160] sm:$0xff]  ;;  %v35_v11 = vld [vmem:[%s4140_s0 + $0x30] sm:$0xff] }
  0x1e   :  { %2537 = vmatprep.subr.bf16.mxu1 %v2536_v28  ;;  %v2568_v12 = vpack.c.bf16 %v84_v10, %v81_v9  ;;  %v36_v14 = vld [vmem:[%s4140_s0 + $0x38] sm:$0xff]  ;;  %v346_v15 = vld [vmem:[%s4139_s2 + $0x10] sm:$0xff]  ;;  %v349_v16 = vld [vmem:[%s4139_s2 + $0x28] sm:$0xff] }
  0x1f   :  { %2599 = vmatpush1.bf16.msra.mxu0 %v3462_v32  ;;  %v3590_v19 = vpack.c.bf16 %v349_v16, %v346_v15  ;;  %v352_v22 = vld [vmem:[%s4139_s2 + $0x40] sm:$0xff]  ;;  %v355_v23 = vld [vmem:[%s4139_s2 + $0x58] sm:$0xff]  ;;  %v358_v25 = vld [vmem:[%s4139_s2 + $0x70] sm:$0xff] }
  0x20   :  { %2601 = vmatprep.subr.bf16.mxu0 %v3471_v36  ;;  %v3603_v24 = vpack.c.bf16 %v355_v23, %v352_v22  ;;  %v361_v27 = vld [vmem:[%s4139_s2 + $0x88] sm:$0xff]  ;;  %v364_v29 = vld [vmem:[%s4139_s2 + $0xa0] sm:$0xff]  ;;  %v367_v31 = vld [vmem:[%s4139_s2 + $0xb8] sm:$0xff] }
  0x21   :  { %2539 = vmatpush1.bf16.msra.mxu1 %v2538_v39  ;;  %v3614_v28 = vpack.c.bf16 %v361_v27, %v358_v25  ;;  %v3624_v33 = vpack.c.bf16 %v367_v31, %v364_v29  ;;  %v370_v34 = vld [vmem:[%s4139_s2 + $0xd0] sm:$0xff]  ;;  %v373_v37 = vld [vmem:[%s4139_s2 + $0xe8] sm:$0xff]  ;;  %v376_v39 = vld [vmem:[%s4139_s2 + $0x100] sm:$0xff] }
  0x22   :  { %2541 = vmatprep.subr.bf16.mxu1 %v2540_v40  ;;  %v3634_v38 = vpack.c.bf16 %v373_v37, %v370_v34  ;;  %v382_v44 = vld [vmem:[%s4139_s2 + $0x130] sm:$0xff]  ;;  %v388_v48 = vld [vmem:[%s4139_s2 + $0x160] sm:$0xff]  ;;  %v391_v49 = vld [vmem:[%s4139_s2 + $0x178] sm:$0xff] }
  0x23   :  { %2603 = vmatpush1.bf16.msra.mxu0 %v3480_v41  ;;  %v3700_v57 = vld [vmem:[%s4142_s4] sm:$0x7] }
  0x24   :  { %167 = vmatmul.mubr.f32.vlgmr.msra.gmra.mrb[0].mxu1 %v3492_v45  ;;  %2629 = vmatprep.subr.bf16.mxu0 %v3265_v13 }
  0x25   :  { %2543 = vmatpush3.bf16.msra.mxu1 %v2540_v40  ;;  %172 = vmatprep.mubr.f32.mxu1 %v4148_v3  ;;  %v379_v40 = vld [vmem:[%s4139_s2 + $0x118] sm:$0xff] }
  0x26   :  { %2545 = vmatprep.subr.bf16.mxu1 %v2544_v47  ;;  %480 = vmatmul.mubr.f32.vlgmr.msra.gmra.mrb[0].mxu0 %v4148_v3  ;;  %v3646_v43 = vpack.c.bf16 %v379_v40, %v376_v39 }
  0x27   :  { %2631 = vmatpush1.bf16.msra.mxu0 %v3276_v18  ;;  %648 = vmatprep.mubr.f32.mxu0 %v4148_v3 }
  0x28   :  { %173 = vmatmul.mubr.f32.gmra.mrb[2].mxu1 %v3507_v50  ;;  %2633 = vmatprep.subr.bf16.mxu0 %v3298_v26 }
  0x29   :  { %2547 = vmatpush3.bf16.msra.mxu1 %v2544_v47  ;;  %178 = vmatprep.mubr.f32.mxu1 %v4148_v3 }
  0x2a   :  { %2549 = vmatprep.subr.bf16.mxu1 %v2548_v51 }
  0x2b   :  { %2635 = vmatpush1.bf16.msra.mxu0 %v3309_v30 }
  0x2c   :  { %179 = vmatmul.mubr.f32.gmra.mrb[4].mxu1 %v3524_v54  ;;  %2637 = vmatprep.subr.bf16.mxu0 %v3321_v35 }
  0x2d   :  { %2551 = vmatpush3.bf16.msra.mxu1 %v2548_v51  ;;  %184 = vmatprep.mubr.f32.mxu1 %v4148_v3  ;;  %v87_v51 = vlaneseq }
  0x2e   :  { %2553 = vmatprep.subr.bf16.mxu1 %v2552_v56 }
  0x2f   :  { %2639 = vmatpush1.bf16.msra.mxu0 %v3339_v42  ;;  %v3690_v52 = vshrl.u32 %v87_v51, 7 }
  0x30   :  { %185 = vmatmul.mubr.f32.gmra.mrb[6].mxu1 %v32_v60  ;;  %2641 = vmatprep.subr.bf16.mxu0 %v3351_v46 }
  0x31   :  { %2555 = vmatpush3.bf16.msra.mxu1 %v2552_v56  ;;  %190 = vmatprep.mubr.f32.mxu1 %v4148_v3  ;;  %v89_v53 = vsub.s32 0, %v3690_v52  ;;  %v93_v56 = vsub.s32 1, %v3690_v52 }
  0x32   :  { %2557 = vmatprep.subr.bf16.mxu1 %v2556_v61 }
  0x33   :  { %2643 = vmatpush1.bf16.msra.mxu0 %v3372_v55  ;;  %v407_v63 = vrot.slane %v3700_v57, %v93_v56 }
  0x34   :  { %191 = vmatmul.mubr.f32.gmra.mrb[8].mxu1 %v33_v0  ;;  %2645 = vmatprep.subr.bf16.mxu0 %v3381_v58 }
  0x35   :  { %2559 = vmatpush3.bf16.msra.mxu1 %v2556_v61  ;;  %196 = vmatprep.mubr.f32.mxu1 %v4148_v3  ;;  %v403_v61 = vrot.slane %v3700_v57, %v89_v53 }
  0x36   :  { %2561 = vmatprep.subr.bf16.mxu1 %v2560_v1 }
  0x37   :  { %2647 = vmatpush1.bf16.msra.mxu0 %v3402_v4 }
  0x38   :  { %197 = vmatmul.mubr.f32.gmra.mrb[10].mxu1 %v34_v6  ;;  %2649 = vmatprep.subr.bf16.mxu0 %v3411_v7 }
  0x39   :  { %2563 = vmatpush3.bf16.msra.mxu1 %v2560_v1  ;;  %202 = vmatprep.mubr.f32.mxu1 %v4148_v3 }
  0x3a   :  { %2565 = vmatprep.subr.bf16.mxu1 %v2564_v8 }
  0x3b   :  { %2651 = vmatpush1.bf16.msra.mxu0 %v3432_v17 }
  0x3c   :  { %203 = vmatmul.mubr.f32.gmra.mrb[12].mxu1 %v35_v11  ;;  %2653 = vmatprep.subr.bf16.mxu0 %v3441_v21 }
  0x3d   :  { %2567 = vmatpush3.bf16.msra.mxu1 %v2564_v8  ;;  %208 = vmatprep.mubr.f32.mxu1 %v4148_v3 }
  0x3e   :  { %2569 = vmatprep.subr.bf16.mxu1 %v2568_v12 }
  0x3f   :  { %2655 = vmatpush1.bf16.msra.mxu0 %v3462_v32 }
  0x40   :  { %209 = vmatmul.mubr.f32.gmra.mrb[14].mxu1 %v36_v14  ;;  %2657 = vmatprep.subr.bf16.mxu0 %v3471_v36 }
  0x41   :  { %2571 = vmatpush3.bf16.msra.mxu1 %v2568_v12  ;;  %2172 = vmatprep.mubr.f32.mxu1 %v3492_v45  ;;  %v385_v45 = vld [vmem:[%s4139_s2 + $0x148] sm:$0xff] }
  0x42   :  { %2604 = vmatprep.subr.bf16.mxu1 %v4150_v20  ;;  %v3656_v47 = vpack.c.bf16 %v385_v45, %v382_v44 }
  0x43   :  { %2659 = vmatpush1.bf16.msra.mxu0 %v3480_v41 }
  0x44   :  { %2173 = vmatmul.mubr.f32.vlgmr.msra.gmra.mrb[16].mxu1 %v3507_v50  ;;  %2685 = vmatprep.subr.bf16.mxu0 %v3265_v13  ;;  %v3666_v50 = vpack.c.bf16 %v391_v49, %v388_v48 }
  0x45   :  { %2606 = vmatpush3.bf16.msra.mxu1 %v3590_v19  ;;  %2175 = vmatprep.mubr.f32.mxu1 %v3524_v54  ;;  %v85_v54 = vld [vmem:[%s4141_s3] sm:$0x7] }
  0x46   :  { %2607 = vmatprep.subr.bf16.mxu1 %v4150_v20  ;;  %v90_v59 = vrot.slane %v85_v54, %v89_v53 }
  0x48   :  { %2176 = vmatmul.mubr.f32.gmra.mrb[18].mxu1 %v32_v60  ;;  %v94_v60 = vrot.slane %v85_v54, %v93_v56 }
  0x49   :  { %2609 = vmatpush3.bf16.msra.mxu1 %v3603_v24  ;;  %2178 = vmatprep.mubr.f32.mxu1 %v33_v0 }
  0x4a   :  { %2610 = vmatprep.subr.bf16.mxu1 %v4150_v20 }
  0x4c   :  { %2179 = vmatmul.mubr.f32.gmra.mrb[20].mxu1 %v34_v6 }
  0x4d   :  { %2612 = vmatpush3.bf16.msra.mxu1 %v3614_v28  ;;  %2181 = vmatprep.mubr.f32.mxu1 %v35_v11 }
  0x4e   :  { %2613 = vmatprep.subr.bf16.mxu1 %v4150_v20 }
  0x50   :  { %2182 = vmatmul.mubr.f32.gmra.mrb[22].mxu1 %v36_v14 }
  0x51   :  { %2615 = vmatpush3.bf16.msra.mxu1 %v3624_v33  ;;  %2216 = vmatprep.mubr.msk.f32.mxu1 %vm3185_vm0, %v4148_v3 }
  0x52   :  { %2616 = vmatprep.subr.bf16.mxu1 %v4150_v20 }
  0x55   :  { %2618 = vmatpush3.bf16.msra.mxu1 %v3634_v38 }
  0x56   :  { %2619 = vmatprep.subr.bf16.mxu1 %v4150_v20 }
  0x59   :  { %2621 = vmatpush3.bf16.msra.mxu1 %v3646_v43 }
  0x5a   :  { %2622 = vmatprep.subr.bf16.mxu1 %v4150_v20 }
  0x5d   :  { %2624 = vmatpush3.bf16.msra.mxu1 %v3656_v47 }
  0x5e   :  { %2625 = vmatprep.subr.bf16.mxu1 %v4150_v20 }
  0x61   :  { %2627 = vmatpush3.bf16.msra.mxu1 %v3666_v50 }
  0x62   :  { %2660 = vmatprep.subr.bf16.mxu1 %v4150_v20 }
  0x64   :  { %2217 = vmatmul.mubr.f32.vlgmr.msra.gmra.mrb[24].mxu1 %v4148_v3 }
  0x65   :  { %2662 = vmatpush3.bf16.msra.mxu1 %v3590_v19  ;;  %2251 = vmatprep.mubr.msk.f32.mxu1 %vm3185_vm0, %v4148_v3 }
  0x66   :  { %2663 = vmatprep.subr.bf16.mxu1 %v4150_v20 }
  0x69   :  { %2665 = vmatpush3.bf16.msra.mxu1 %v3603_v24 }
  0x6a   :  { %2666 = vmatprep.subr.bf16.mxu1 %v4150_v20 }
  0x6d   :  { %2668 = vmatpush3.bf16.msra.mxu1 %v3614_v28 }
  0x6e   :  { %2669 = vmatprep.subr.bf16.mxu1 %v4150_v20 }
  0x71   :  { %2671 = vmatpush3.bf16.msra.mxu1 %v3624_v33 }
  0x72   :  { %2672 = vmatprep.subr.bf16.mxu1 %v4150_v20 }
  0x75   :  { %2674 = vmatpush3.bf16.msra.mxu1 %v3634_v38 }
  0x76   :  { %2675 = vmatprep.subr.bf16.mxu1 %v4150_v20 }
  0x79   :  { %2677 = vmatpush3.bf16.msra.mxu1 %v3646_v43 }
  0x7a   :  { %2678 = vmatprep.subr.bf16.mxu1 %v4150_v20 }
  0x7d   :  { %2680 = vmatpush3.bf16.msra.mxu1 %v3656_v47 }
  0x7e   :  { %2681 = vmatprep.subr.bf16.mxu1 %v4150_v20 }
  0x81   :  { %2683 = vmatpush3.bf16.msra.mxu1 %v3666_v50 }
  0x82   :  { %2716 = vmatprep.subr.bf16.mxu1 %v4150_v20 }
  0xf7   :  { %v168_v62 = vpop.f32.mrb[0].mxu1 }
  0xf8   :  { %v169_v0 = vadd.f32 %v168_v62, %v90_v59  ;;  %v170_v1 = vpop.f32.mrb[1].mxu1 }
  0xf9   :  { %v171_v2 = vadd.f32 %v170_v1, %v94_v60  ;;  %v481_v5 = vpop.f32.mrb[0].mxu0 }
  0xfa   :  { %v3053_v6 = vadd.f32 %v403_v61, %v169_v0  ;;  %v483_v8 = vpop.f32.mrb[1].mxu0 }
  0xfb   :  { %v174_v9 = vpop.f32.mrb[2].mxu1  ;;  %v3056_v10 = vadd.f32 %v407_v63, %v171_v2 }
  0xfc   :  { %v175_v11 = vadd.f32 %v174_v9, %v90_v59  ;;  %v3054_v12 = vadd.f32 %v3053_v6, %v481_v5  ;;  %v176_v14 = vpop.f32.mrb[3].mxu1 }
  0xfd   :  { %v177_v15 = vadd.f32 %v176_v14, %v94_v60  ;;  %v3057_v16 = vadd.f32 %v3056_v10, %v483_v8 }
  0xfe   :  { %v3704_v22 = vadd.f32 %v403_v61, %v175_v11 }
  0xff   :  { %v180_v23 = vpop.f32.mrb[4].mxu1  ;;  %v3706_v25 = vadd.f32 %v407_v63, %v177_v15 }
 0x100   :  { %v181_v27 = vadd.f32 %v180_v23, %v90_v59  ;;  %v182_v29 = vpop.f32.mrb[5].mxu1  ;;  %v97_v23 = vsub.s32 2, %v3690_v52 }
 0x101   :  { %v183_v31 = vadd.f32 %v182_v29, %v94_v60 }
 0x102   :  { %v3708_v34 = vadd.f32 %v403_v61, %v181_v27 }
 0x103   :  { %v186_v37 = vpop.f32.mrb[6].mxu1  ;;  %v3710_v39 = vadd.f32 %v407_v63, %v183_v31 }
 0x104   :  { %v187_v40 = vadd.f32 %v186_v37, %v90_v59  ;;  %v188_v44 = vpop.f32.mrb[7].mxu1 }
 0x105   :  { %v189_v45 = vadd.f32 %v188_v44, %v94_v60 }
 0x106   :  { %v3712_v48 = vadd.f32 %v403_v61, %v187_v40 }
 0x107   :  { %v192_v49 = vpop.f32.mrb[8].mxu1  ;;  %v3714_v51 = vadd.f32 %v407_v63, %v189_v45  ;;  %v98_v45 = vrot.slane %v85_v54, %v97_v23 }
 0x108   :  { %v193_v53 = vadd.f32 %v192_v49, %v90_v59  ;;  %v194_v56 = vpop.f32.mrb[9].mxu1 }
 0x109   :  { %v195_v62 = vadd.f32 %v194_v56, %v94_v60 }
 0x10a   :  { %v3716_v0 = vadd.f32 %v403_v61, %v193_v53 }
 0x10b   :  { %v198_v1 = vpop.f32.mrb[10].mxu1  ;;  %v3718_v2 = vadd.f32 %v407_v63, %v195_v62 }
 0x10c   :  { %v199_v5 = vadd.f32 %v198_v1, %v90_v59  ;;  %v200_v6 = vpop.f32.mrb[11].mxu1 }
 0x10d   :  { %v201_v8 = vadd.f32 %v200_v6, %v94_v60  ;;  %v1932_v6 = vmul.f32 -1.442695, %v3054_v12 }
 0x10e   :  { %v3720_v9 = vadd.f32 %v403_v61, %v199_v5 }
 0x10f   :  { %v204_v10 = vpop.f32.mrb[12].mxu1  ;;  %v3722_v11 = vadd.f32 %v407_v63, %v201_v8  ;;  %3103 = vpow2.f32 %v1932_v6 }
 0x110   :  { %v205_v14 = vadd.f32 %v204_v10, %v90_v59  ;;  %v206_v15 = vpop.f32.mrb[13].mxu1 }
 0x111   :  { %v207_v27 = vadd.f32 %v206_v15, %v94_v60 }
 0x112   :  { %v3725_v29 = vadd.f32 %v403_v61, %v205_v14 }
 0x113   :  { %v210_v31 = vpop.f32.mrb[14].mxu1  ;;  %v3727_v37 = vadd.f32 %v407_v63, %v207_v27 }
 0x114   :  { %v211_v40 = vadd.f32 %v210_v31, %v90_v59  ;;  %v212_v44 = vpop.f32.mrb[15].mxu1  ;;  %v1933_v31 = vmul.f32 -1.442695, %v3057_v16 }
 0x115   :  { %v213_v49 = vadd.f32 %v212_v44, %v94_v60 }
 0x116   :  { %v3729_v53 = vadd.f32 %v403_v61, %v211_v40  ;;  %3105 = vpow2.f32 %v1933_v31 }
 0x117   :  { %v2174_v56 = vpop.f32.mrb[16].mxu1  ;;  %v3731_v62 = vadd.f32 %v407_v63, %v213_v49 }
 0x118   :  { %v3733_v1 = vadd.f32 %v2174_v56, %v98_v45  ;;  %v281_v5 = vpop.f32.mrb[17].mxu1  ;;  %v3748_v56 = vrot.slane %v3700_v57, %v97_v23 }
 0x119   :  { %v3104_v12 = vpop.eup %3103 }
 0x11a   :  { %v560_v44 = vadd.f32 1.0, %v3104_v12 }
 0x11b   :  { %v2177_v52 = vpop.f32.mrb[18].mxu1 }
 0x11c   :  { %v3735_v8 = vadd.f32 %v2177_v52, %v98_v45  ;;  %v291_v10 = vpop.f32.mrb[19].mxu1  ;;  %3107 = vrcp.f32 %v560_v44 }
 0x11d   :  { %v3737_v14 = vadd.f32 %v291_v10, %v98_v45 }
 0x11f   :  { %v2180_v59 = vpop.f32.mrb[20].mxu1 }
 0x120   :  { %v3739_v15 = vadd.f32 %v2180_v59, %v98_v45  ;;  %v301_v54 = vpop.f32.mrb[21].mxu1  ;;  %v3106_v49 = vpop.eup %3105 }
 0x121   :  { %v3741_v60 = vadd.f32 %v301_v54, %v98_v45  ;;  %v567_v6 = vadd.f32 1.0, %v3106_v49 }
 0x123   :  { %v2183_v61 = vpop.f32.mrb[22].mxu1  ;;  %3109 = vrcp.f32 %v567_v6 }
 0x124   :  { %v3743_v63 = vadd.f32 %v2183_v61, %v98_v45  ;;  %v311_v27 = vpop.f32.mrb[23].mxu1  ;;  %v282_v61 = vadd.f32 %v281_v5, %v98_v45 }
 0x125   :  { %v3745_v40 = vadd.f32 %v311_v27, %v98_v45 }
 0x126   :  { %4152 = vst [vmem:[#allocation3_spill] sm:$0xff] %v3743_v63  ;;  %v3108_v54 = vpop.eup %3107 }
 0x12d   :  { %v3110_v27 = vpop.eup %3109 }
 0x12e   :  { %v573_v20 = vsub.f32 1.0, %v3110_v27  ;;  %v575_v44 = vmul.f32 0.0, %v3110_v27 }
 0x137   :  { %v552_v52 = vpop.f32.mrb[24].mxu1 }
 0x138   :  { %v553_v10 = vadd.f32 %v552_v52, %v3748_v56  ;;  %v2218_v59 = vpop.f32.mrb[25].mxu1 }
 0x13a   :  { %v570_v3 = vmul.f32 %v3108_v54, %v553_v10 }
 0x13c   :  { %v571_v16 = vadd.f32 %v570_v3, %v282_v61  ;;  %v4153_v3 = vmov 0.0|0.0  }
 0x13e   :  { %3111 = vtanh.f32 %v571_v16 }
 0x148   :  { %v3112_v31 = vpop.eup %3111 }
 0x149   :  { %v574_v12 = vmul.f32 %v3112_v31, %v573_v20  ;;  %v4154_v20 = vmov 0.0  }
 0x14b   :  { %v3751_v63 = vadd.f32 %v575_v44, %v574_v12 }
 0x14d   :  { %577 = vst [vmem:[%s4143_s7] sm:$0xff] %v3751_v63  ;;  %649 = vmatmul.mubr.f32.vlgmr.msra.gmra.mrb[2].mxu0 %v3751_v63  ;;  %2252 = vmatmul.mubr.f32.vlgmr.msra.gmra.mrb[26].mxu1 %v3751_v63 }
 0x14e   :  { %2687 = vmatpush1.bf16.msra.mxu0 %v3276_v18  ;;  %2718 = vmatpush3.bf16.msra.mxu1 %v3590_v19 }
 0x14f   :  { %2689 = vmatprep.subr.bf16.mxu0 %v3298_v26  ;;  %2719 = vmatprep.subr.bf16.mxu1 %v4153_v3 }
 0x150   :  { %818 = vmatprep.mubr.f32.mxu0 %v4154_v20  ;;  %2286 = vmatprep.mubr.msk.f32.mxu1 %vm3185_vm0, %v4154_v20 }
 0x152   :  { %2691 = vmatpush1.bf16.msra.mxu0 %v3309_v30  ;;  %2721 = vmatpush3.bf16.msra.mxu1 %v3603_v24 }
 0x153   :  { %2693 = vmatprep.subr.bf16.mxu0 %v3321_v35  ;;  %2722 = vmatprep.subr.bf16.mxu1 %v4153_v3 }
 0x156   :  { %2695 = vmatpush1.bf16.msra.mxu0 %v3339_v42  ;;  %2724 = vmatpush3.bf16.msra.mxu1 %v3614_v28 }
 0x157   :  { %2697 = vmatprep.subr.bf16.mxu0 %v3351_v46  ;;  %2725 = vmatprep.subr.bf16.mxu1 %v4153_v3 }
 0x15a   :  { %2699 = vmatpush1.bf16.msra.mxu0 %v3372_v55  ;;  %2727 = vmatpush3.bf16.msra.mxu1 %v3624_v33 }
 0x15b   :  { %2701 = vmatprep.subr.bf16.mxu0 %v3381_v58  ;;  %2728 = vmatprep.subr.bf16.mxu1 %v4153_v3 }
 0x15e   :  { %2703 = vmatpush1.bf16.msra.mxu0 %v3402_v4  ;;  %2730 = vmatpush3.bf16.msra.mxu1 %v3634_v38 }
 0x15f   :  { %2705 = vmatprep.subr.bf16.mxu0 %v3411_v7  ;;  %2731 = vmatprep.subr.bf16.mxu1 %v4153_v3 }
 0x162   :  { %2707 = vmatpush1.bf16.msra.mxu0 %v3432_v17  ;;  %2733 = vmatpush3.bf16.msra.mxu1 %v3646_v43 }
 0x163   :  { %2709 = vmatprep.subr.bf16.mxu0 %v3441_v21  ;;  %2734 = vmatprep.subr.bf16.mxu1 %v4153_v3 }
 0x166   :  { %2711 = vmatpush1.bf16.msra.mxu0 %v3462_v32  ;;  %2736 = vmatpush3.bf16.msra.mxu1 %v3656_v47 }
 0x167   :  { %2713 = vmatprep.subr.bf16.mxu0 %v3471_v36  ;;  %2737 = vmatprep.subr.bf16.mxu1 %v4153_v3 }
 0x16a   :  { %2715 = vmatpush1.bf16.msra.mxu0 %v3480_v41  ;;  %2739 = vmatpush3.bf16.msra.mxu1 %v3666_v50 }
 0x16b   :  { %2741 = vmatprep.subr.bf16.mxu0 %v3265_v13  ;;  %2772 = vmatprep.subr.bf16.mxu1 %v4153_v3 }
 0x220   :  { %v650_v57 = vpop.f32.mrb[2].mxu0  ;;  %v721_v23 = vpop.f32.mrb[26].mxu1 }
 0x221   :  { %v3060_v45 = vadd.f32 %v3704_v22, %v650_v57  ;;  %v652_v5 = vpop.f32.mrb[3].mxu0  ;;  %v2253_v49 = vpop.f32.mrb[27].mxu1  ;;  %v722_v27 = vadd.f32 %v721_v23, %v3748_v56 }
 0x222   :  { %v3063_v6 = vadd.f32 %v3706_v25, %v652_v5 }
 0x223   :  { %v1934_v52 = vmul.f32 -1.442695, %v3060_v45 }
 0x224   :  { %v1935_v10 = vmul.f32 -1.442695, %v3063_v6 }
 0x225   :  { %3113 = vpow2.f32 %v1934_v52 }
 0x226   :  { %3115 = vpow2.f32 %v1935_v10 }
 0x22f   :  { %v3114_v59 = vpop.eup %3113 }
 0x230   :  { %v729_v54 = vadd.f32 1.0, %v3114_v59  ;;  %v3116_v61 = vpop.eup %3115 }
 0x231   :  { %v736_v16 = vadd.f32 1.0, %v3116_v61 }
 0x232   :  { %3117 = vrcp.f32 %v729_v54 }
 0x233   :  { %3119 = vrcp.f32 %v736_v16 }
 0x23c   :  { %v3118_v31 = vpop.eup %3117 }
 0x23d   :  { %v739_v12 = vmul.f32 %v3118_v31, %v722_v27  ;;  %v3120_v44 = vpop.eup %3119 }
 0x23e   :  { %v742_v57 = vsub.f32 1.0, %v3120_v44  ;;  %v744_v5 = vmul.f32 %v3120_v44, %v3751_v63 }
 0x23f   :  { %v740_v22 = vadd.f32 %v739_v12, %v3733_v1 }
 0x241   :  { %3121 = vtanh.f32 %v740_v22 }
 0x24b   :  { %v3122_v25 = vpop.eup %3121 }
 0x24c   :  { %v743_v45 = vmul.f32 %v3122_v25, %v742_v57 }
 0x24e   :  { %v3799_v49 = vadd.f32 %v744_v5, %v743_v45 }
 0x250   :  { %1936 = vst [vmem:[%s4143_s7 + $0x8] sm:$0xff] %v3799_v49  ;;  %819 = vmatmul.mubr.f32.vlgmr.msra.gmra.mrb[4].mxu0 %v3799_v49  ;;  %2287 = vmatmul.mubr.f32.vlgmr.msra.gmra.mrb[28].mxu1 %v3799_v49 }
 0x251   :  { %2743 = vmatpush1.bf16.msra.mxu0 %v3276_v18  ;;  %2774 = vmatpush3.bf16.msra.mxu1 %v3590_v19 }
 0x252   :  { %2745 = vmatprep.subr.bf16.mxu0 %v3298_v26  ;;  %2775 = vmatprep.subr.bf16.mxu1 %v4153_v3 }
 0x253   :  { %988 = vmatprep.mubr.f32.mxu0 %v4154_v20  ;;  %2321 = vmatprep.mubr.msk.f32.mxu1 %vm3185_vm0, %v4154_v20 }
 0x255   :  { %2747 = vmatpush1.bf16.msra.mxu0 %v3309_v30  ;;  %2777 = vmatpush3.bf16.msra.mxu1 %v3603_v24 }
 0x256   :  { %2749 = vmatprep.subr.bf16.mxu0 %v3321_v35  ;;  %2778 = vmatprep.subr.bf16.mxu1 %v4153_v3 }
 0x259   :  { %2751 = vmatpush1.bf16.msra.mxu0 %v3339_v42  ;;  %2780 = vmatpush3.bf16.msra.mxu1 %v3614_v28 }
 0x25a   :  { %2753 = vmatprep.subr.bf16.mxu0 %v3351_v46  ;;  %2781 = vmatprep.subr.bf16.mxu1 %v4153_v3 }
 0x25d   :  { %2755 = vmatpush1.bf16.msra.mxu0 %v3372_v55  ;;  %2783 = vmatpush3.bf16.msra.mxu1 %v3624_v33 }
 0x25e   :  { %2757 = vmatprep.subr.bf16.mxu0 %v3381_v58  ;;  %2784 = vmatprep.subr.bf16.mxu1 %v4153_v3 }
 0x261   :  { %2759 = vmatpush1.bf16.msra.mxu0 %v3402_v4  ;;  %2786 = vmatpush3.bf16.msra.mxu1 %v3634_v38 }
 0x262   :  { %2761 = vmatprep.subr.bf16.mxu0 %v3411_v7  ;;  %2787 = vmatprep.subr.bf16.mxu1 %v4153_v3 }
 0x265   :  { %2763 = vmatpush1.bf16.msra.mxu0 %v3432_v17  ;;  %2789 = vmatpush3.bf16.msra.mxu1 %v3646_v43 }
 0x266   :  { %2765 = vmatprep.subr.bf16.mxu0 %v3441_v21  ;;  %2790 = vmatprep.subr.bf16.mxu1 %v4153_v3 }
 0x269   :  { %2767 = vmatpush1.bf16.msra.mxu0 %v3462_v32  ;;  %2792 = vmatpush3.bf16.msra.mxu1 %v3656_v47 }
 0x26a   :  { %2769 = vmatprep.subr.bf16.mxu0 %v3471_v36  ;;  %2793 = vmatprep.subr.bf16.mxu1 %v4153_v3 }
 0x26d   :  { %2771 = vmatpush1.bf16.msra.mxu0 %v3480_v41  ;;  %2795 = vmatpush3.bf16.msra.mxu1 %v3666_v50 }
 0x26e   :  { %2797 = vmatprep.subr.bf16.mxu0 %v3265_v13  ;;  %2828 = vmatprep.subr.bf16.mxu1 %v4153_v3 }
 0x323   :  { %v820_v1 = vpop.f32.mrb[4].mxu0  ;;  %v891_v23 = vpop.f32.mrb[28].mxu1 }
 0x324   :  { %v3066_v6 = vadd.f32 %v3708_v34, %v820_v1  ;;  %v822_v52 = vpop.f32.mrb[5].mxu0  ;;  %v2288_v10 = vpop.f32.mrb[29].mxu1  ;;  %v892_v22 = vadd.f32 %v891_v23, %v3748_v56 }
 0x325   :  { %v3069_v59 = vadd.f32 %v3710_v39, %v822_v52 }
 0x326   :  { %v1937_v54 = vmul.f32 -1.442695, %v3066_v6 }
 0x327   :  { %v1938_v61 = vmul.f32 -1.442695, %v3069_v59 }
 0x328   :  { %3123 = vpow2.f32 %v1937_v54 }
 0x329   :  { %3125 = vpow2.f32 %v1938_v61 }
 0x332   :  { %v3124_v16 = vpop.eup %3123 }
 0x333   :  { %v899_v27 = vadd.f32 1.0, %v3124_v16  ;;  %v3126_v31 = vpop.eup %3125 }
 0x334   :  { %v906_v12 = vadd.f32 1.0, %v3126_v31 }
 0x335   :  { %3127 = vrcp.f32 %v899_v27 }
 0x336   :  { %3129 = vrcp.f32 %v906_v12 }
 0x33f   :  { %v3128_v44 = vpop.eup %3127 }
 0x340   :  { %v909_v57 = vmul.f32 %v3128_v44, %v892_v22  ;;  %v3130_v25 = vpop.eup %3129 }
 0x341   :  { %v912_v45 = vsub.f32 1.0, %v3130_v25  ;;  %v914_v1 = vmul.f32 %v3130_v25, %v3799_v49 }
 0x342   :  { %v910_v34 = vadd.f32 %v909_v57, %v3737_v14 }
 0x344   :  { %3131 = vtanh.f32 %v910_v34 }
 0x34e   :  { %v3132_v39 = vpop.eup %3131 }
 0x34f   :  { %v913_v5 = vmul.f32 %v3132_v39, %v912_v45 }
 0x351   :  { %v3847_v6 = vadd.f32 %v914_v1, %v913_v5 }
 0x353   :  { %1939 = vst [vmem:[%s4143_s7 + $0x10] sm:$0xff] %v3847_v6  ;;  %989 = vmatmul.mubr.f32.vlgmr.msra.gmra.mrb[6].mxu0 %v3847_v6  ;;  %2322 = vmatmul.mubr.f32.vlgmr.msra.gmra.mrb[30].mxu1 %v3847_v6 }
 0x354   :  { %2799 = vmatpush1.bf16.msra.mxu0 %v3276_v18  ;;  %2830 = vmatpush3.bf16.msra.mxu1 %v3590_v19 }
 0x355   :  { %2801 = vmatprep.subr.bf16.mxu0 %v3298_v26  ;;  %2831 = vmatprep.subr.bf16.mxu1 %v4153_v3 }
 0x356   :  { %1158 = vmatprep.mubr.f32.mxu0 %v4154_v20  ;;  %2356 = vmatprep.mubr.msk.f32.mxu1 %vm3185_vm0, %v4154_v20 }
 0x358   :  { %2803 = vmatpush1.bf16.msra.mxu0 %v3309_v30  ;;  %2833 = vmatpush3.bf16.msra.mxu1 %v3603_v24 }
 0x359   :  { %2805 = vmatprep.subr.bf16.mxu0 %v3321_v35  ;;  %2834 = vmatprep.subr.bf16.mxu1 %v4153_v3 }
 0x35c   :  { %2807 = vmatpush1.bf16.msra.mxu0 %v3339_v42  ;;  %2836 = vmatpush3.bf16.msra.mxu1 %v3614_v28 }
 0x35d   :  { %2809 = vmatprep.subr.bf16.mxu0 %v3351_v46  ;;  %2837 = vmatprep.subr.bf16.mxu1 %v4153_v3 }
 0x360   :  { %2811 = vmatpush1.bf16.msra.mxu0 %v3372_v55  ;;  %2839 = vmatpush3.bf16.msra.mxu1 %v3624_v33 }
 0x361   :  { %2813 = vmatprep.subr.bf16.mxu0 %v3381_v58  ;;  %2840 = vmatprep.subr.bf16.mxu1 %v4153_v3 }
 0x364   :  { %2815 = vmatpush1.bf16.msra.mxu0 %v3402_v4  ;;  %2842 = vmatpush3.bf16.msra.mxu1 %v3634_v38 }
 0x365   :  { %2817 = vmatprep.subr.bf16.mxu0 %v3411_v7  ;;  %2843 = vmatprep.subr.bf16.mxu1 %v4153_v3 }
 0x368   :  { %2819 = vmatpush1.bf16.msra.mxu0 %v3432_v17  ;;  %2845 = vmatpush3.bf16.msra.mxu1 %v3646_v43 }
 0x369   :  { %2821 = vmatprep.subr.bf16.mxu0 %v3441_v21  ;;  %2846 = vmatprep.subr.bf16.mxu1 %v4153_v3 }
 0x36c   :  { %2823 = vmatpush1.bf16.msra.mxu0 %v3462_v32  ;;  %2848 = vmatpush3.bf16.msra.mxu1 %v3656_v47 }
 0x36d   :  { %2825 = vmatprep.subr.bf16.mxu0 %v3471_v36  ;;  %2849 = vmatprep.subr.bf16.mxu1 %v4153_v3 }
 0x370   :  { %2827 = vmatpush1.bf16.msra.mxu0 %v3480_v41  ;;  %2851 = vmatpush3.bf16.msra.mxu1 %v3666_v50 }
 0x371   :  { %2853 = vmatprep.subr.bf16.mxu0 %v3265_v13  ;;  %2884 = vmatprep.subr.bf16.mxu1 %v4153_v3 }
 0x426   :  { %v990_v14 = vpop.f32.mrb[6].mxu0  ;;  %v1061_v23 = vpop.f32.mrb[30].mxu1 }
 0x427   :  { %v3072_v52 = vadd.f32 %v3712_v48, %v990_v14  ;;  %v992_v10 = vpop.f32.mrb[7].mxu0  ;;  %v2323_v59 = vpop.f32.mrb[31].mxu1  ;;  %v1062_v44 = vadd.f32 %v1061_v23, %v3748_v56 }
 0x428   :  { %v3075_v54 = vadd.f32 %v3714_v51, %v992_v10 }
 0x429   :  { %v1940_v61 = vmul.f32 -1.442695, %v3072_v52 }
 0x42a   :  { %v1941_v16 = vmul.f32 -1.442695, %v3075_v54 }
 0x42b   :  { %3133 = vpow2.f32 %v1940_v61 }
 0x42c   :  { %3135 = vpow2.f32 %v1941_v16 }
 0x435   :  { %v3134_v27 = vpop.eup %3133 }
 0x436   :  { %v1069_v31 = vadd.f32 1.0, %v3134_v27  ;;  %v3136_v12 = vpop.eup %3135 }
 0x437   :  { %v1076_v22 = vadd.f32 1.0, %v3136_v12 }
 0x438   :  { %3137 = vrcp.f32 %v1069_v31 }
 0x439   :  { %3139 = vrcp.f32 %v1076_v22 }
 0x442   :  { %v3138_v57 = vpop.eup %3137 }
 0x443   :  { %v1079_v34 = vmul.f32 %v3138_v57, %v1062_v44  ;;  %v3140_v25 = vpop.eup %3139 }
 0x444   :  { %v1082_v45 = vsub.f32 1.0, %v3140_v25  ;;  %v1084_v5 = vmul.f32 %v3140_v25, %v3847_v6 }
 0x445   :  { %v1080_v48 = vadd.f32 %v1079_v34, %v3735_v8 }
 0x447   :  { %3141 = vtanh.f32 %v1080_v48 }
 0x451   :  { %v3142_v51 = vpop.eup %3141 }
 0x452   :  { %v1083_v39 = vmul.f32 %v3142_v51, %v1082_v45 }
 0x454   :  { %v3895_v1 = vadd.f32 %v1084_v5, %v1083_v39 }
 0x456   :  { %1942 = vst [vmem:[%s4143_s7 + $0x18] sm:$0xff] %v3895_v1  ;;  %1159 = vmatmul.mubr.f32.vlgmr.msra.gmra.mrb[8].mxu0 %v3895_v1  ;;  %2357 = vmatmul.mubr.f32.vlgmr.msra.gmra.mrb[32].mxu1 %v3895_v1 }
 0x457   :  { %2855 = vmatpush1.bf16.msra.mxu0 %v3276_v18  ;;  %2886 = vmatpush3.bf16.msra.mxu1 %v3590_v19 }
 0x458   :  { %2857 = vmatprep.subr.bf16.mxu0 %v3298_v26  ;;  %2887 = vmatprep.subr.bf16.mxu1 %v4153_v3 }
 0x459   :  { %1328 = vmatprep.mubr.f32.mxu0 %v4154_v20  ;;  %2391 = vmatprep.mubr.msk.f32.mxu1 %vm3185_vm0, %v4154_v20 }
 0x45b   :  { %2859 = vmatpush1.bf16.msra.mxu0 %v3309_v30  ;;  %2889 = vmatpush3.bf16.msra.mxu1 %v3603_v24 }
 0x45c   :  { %2861 = vmatprep.subr.bf16.mxu0 %v3321_v35  ;;  %2890 = vmatprep.subr.bf16.mxu1 %v4153_v3 }
 0x45f   :  { %2863 = vmatpush1.bf16.msra.mxu0 %v3339_v42  ;;  %2892 = vmatpush3.bf16.msra.mxu1 %v3614_v28 }
 0x460   :  { %2865 = vmatprep.subr.bf16.mxu0 %v3351_v46  ;;  %2893 = vmatprep.subr.bf16.mxu1 %v4153_v3 }
 0x463   :  { %2867 = vmatpush1.bf16.msra.mxu0 %v3372_v55  ;;  %2895 = vmatpush3.bf16.msra.mxu1 %v3624_v33 }
 0x464   :  { %2869 = vmatprep.subr.bf16.mxu0 %v3381_v58  ;;  %2896 = vmatprep.subr.bf16.mxu1 %v4153_v3 }
 0x467   :  { %2871 = vmatpush1.bf16.msra.mxu0 %v3402_v4  ;;  %2898 = vmatpush3.bf16.msra.mxu1 %v3634_v38 }
 0x468   :  { %2873 = vmatprep.subr.bf16.mxu0 %v3411_v7  ;;  %2899 = vmatprep.subr.bf16.mxu1 %v4153_v3 }
 0x46b   :  { %2875 = vmatpush1.bf16.msra.mxu0 %v3432_v17  ;;  %2901 = vmatpush3.bf16.msra.mxu1 %v3646_v43 }
 0x46c   :  { %2877 = vmatprep.subr.bf16.mxu0 %v3441_v21  ;;  %2902 = vmatprep.subr.bf16.mxu1 %v4153_v3 }
 0x46f   :  { %2879 = vmatpush1.bf16.msra.mxu0 %v3462_v32  ;;  %2904 = vmatpush3.bf16.msra.mxu1 %v3656_v47 }
 0x470   :  { %2881 = vmatprep.subr.bf16.mxu0 %v3471_v36  ;;  %2905 = vmatprep.subr.bf16.mxu1 %v4153_v3 }
 0x473   :  { %2883 = vmatpush1.bf16.msra.mxu0 %v3480_v41  ;;  %2907 = vmatpush3.bf16.msra.mxu1 %v3666_v50 }
 0x474   :  { %2909 = vmatprep.subr.bf16.mxu0 %v3265_v13  ;;  %2940 = vmatprep.subr.bf16.mxu1 %v4153_v3 }
 0x529   :  { %v1160_v8 = vpop.f32.mrb[8].mxu0  ;;  %v1231_v14 = vpop.f32.mrb[32].mxu1 }
 0x52a   :  { %v3078_v23 = vadd.f32 %v3716_v0, %v1160_v8  ;;  %v1162_v52 = vpop.f32.mrb[9].mxu0  ;;  %v2358_v10 = vpop.f32.mrb[33].mxu1  ;;  %v1232_v22 = vadd.f32 %v1231_v14, %v3748_v56 }
 0x52b   :  { %v3081_v59 = vadd.f32 %v3718_v2, %v1162_v52 }
 0x52c   :  { %v1943_v54 = vmul.f32 -1.442695, %v3078_v23 }
 0x52d   :  { %v1944_v61 = vmul.f32 -1.442695, %v3081_v59 }
 0x52e   :  { %3143 = vpow2.f32 %v1943_v54 }
 0x52f   :  { %3145 = vpow2.f32 %v1944_v61 }
 0x538   :  { %v3144_v16 = vpop.eup %3143 }
 0x539   :  { %v1239_v27 = vadd.f32 1.0, %v3144_v16  ;;  %v3146_v31 = vpop.eup %3145 }
 0x53a   :  { %v1246_v12 = vadd.f32 1.0, %v3146_v31 }
 0x53b   :  { %3147 = vrcp.f32 %v1239_v27 }
 0x53c   :  { %3149 = vrcp.f32 %v1246_v12 }
 0x545   :  { %v3148_v44 = vpop.eup %3147 }
 0x546   :  { %v1249_v57 = vmul.f32 %v3148_v44, %v1232_v22  ;;  %v3150_v34 = vpop.eup %3149 }
 0x547   :  { %v1252_v48 = vsub.f32 1.0, %v3150_v34  ;;  %v1254_v45 = vmul.f32 %v3150_v34, %v3895_v1  ;;  %v1782_v34 = vld [vmem:[%s4144_s5 + $0x28] sm:$0xff] }
 0x548   :  { %v1250_v0 = vadd.f32 %v1249_v57, %v3741_v60 }
 0x54a   :  { %3151 = vtanh.f32 %v1250_v0 }
 0x554   :  { %v3152_v2 = vpop.eup %3151 }
 0x555   :  { %v1253_v25 = vmul.f32 %v3152_v2, %v1252_v48  ;;  %v1783_v2 = vld [vmem:[%s4144_s5 + $0x30] sm:$0xff] }
 0x557   :  { %v3943_v51 = vadd.f32 %v1254_v45, %v1253_v25  ;;  %v1784_v25 = vld [vmem:[%s4144_s5 + $0x38] sm:$0xff] }
 0x558   :  { %v3032_v45 = vpack.c.bf16 %v1784_v25, %v1783_v2 }
 0x559   :  { %1945 = vst [vmem:[%s4143_s7 + $0x20] sm:$0xff] %v3943_v51  ;;  %1329 = vmatmul.mubr.f32.vlgmr.msra.gmra.mrb[10].mxu0 %v3943_v51  ;;  %2392 = vmatmul.mubr.f32.vlgmr.msra.gmra.mrb[34].mxu1 %v3943_v51 }
 0x55a   :  { %2911 = vmatpush1.bf16.msra.mxu0 %v3276_v18  ;;  %2942 = vmatpush3.bf16.msra.mxu1 %v3590_v19 }
 0x55b   :  { %2913 = vmatprep.subr.bf16.mxu0 %v3298_v26  ;;  %2943 = vmatprep.subr.bf16.mxu1 %v4153_v3 }
 0x55c   :  { %1498 = vmatprep.mubr.f32.mxu0 %v4154_v20  ;;  %2426 = vmatprep.mubr.msk.f32.mxu1 %vm3185_vm0, %v4154_v20 }
 0x55e   :  { %2915 = vmatpush1.bf16.msra.mxu0 %v3309_v30  ;;  %2945 = vmatpush3.bf16.msra.mxu1 %v3603_v24 }
 0x55f   :  { %2917 = vmatprep.subr.bf16.mxu0 %v3321_v35  ;;  %2946 = vmatprep.subr.bf16.mxu1 %v4153_v3 }
 0x562   :  { %2919 = vmatpush1.bf16.msra.mxu0 %v3339_v42  ;;  %2948 = vmatpush3.bf16.msra.mxu1 %v3614_v28 }
 0x563   :  { %2921 = vmatprep.subr.bf16.mxu0 %v3351_v46  ;;  %2949 = vmatprep.subr.bf16.mxu1 %v4153_v3 }
 0x566   :  { %2923 = vmatpush1.bf16.msra.mxu0 %v3372_v55  ;;  %2951 = vmatpush3.bf16.msra.mxu1 %v3624_v33 }
 0x567   :  { %2925 = vmatprep.subr.bf16.mxu0 %v3381_v58  ;;  %2952 = vmatprep.subr.bf16.mxu1 %v4153_v3 }
 0x56a   :  { %2927 = vmatpush1.bf16.msra.mxu0 %v3402_v4  ;;  %2954 = vmatpush3.bf16.msra.mxu1 %v3634_v38 }
 0x56b   :  { %2929 = vmatprep.subr.bf16.mxu0 %v3411_v7  ;;  %2955 = vmatprep.subr.bf16.mxu1 %v4153_v3 }
 0x56e   :  { %2931 = vmatpush1.bf16.msra.mxu0 %v3432_v17  ;;  %2957 = vmatpush3.bf16.msra.mxu1 %v3646_v43 }
 0x56f   :  { %2933 = vmatprep.subr.bf16.mxu0 %v3441_v21  ;;  %2958 = vmatprep.subr.bf16.mxu1 %v4153_v3 }
 0x572   :  { %2935 = vmatpush1.bf16.msra.mxu0 %v3462_v32  ;;  %2960 = vmatpush3.bf16.msra.mxu1 %v3656_v47 }
 0x573   :  { %2937 = vmatprep.subr.bf16.mxu0 %v3471_v36  ;;  %2961 = vmatprep.subr.bf16.mxu1 %v4153_v3 }
 0x576   :  { %2939 = vmatpush1.bf16.msra.mxu0 %v3480_v41  ;;  %2963 = vmatpush3.bf16.msra.mxu1 %v3666_v50 }
 0x577   :  { %2965 = vmatprep.subr.bf16.mxu0 %v3265_v13  ;;  %2996 = vmatprep.subr.bf16.mxu1 %v4153_v3 }
 0x62c   :  { %v1330_v60 = vpop.f32.mrb[10].mxu0  ;;  %v1401_v39 = vpop.f32.mrb[34].mxu1 }
 0x62d   :  { %v3084_v5 = vadd.f32 %v3720_v9, %v1330_v60  ;;  %v1332_v8 = vpop.f32.mrb[11].mxu0  ;;  %v2393_v14 = vpop.f32.mrb[35].mxu1  ;;  %v1402_v13 = vadd.f32 %v1401_v39, %v3748_v56  ;;  %v1785_v60 = vld [vmem:[%s4144_s5 + $0x40] sm:$0xff] }
 0x62e   :  { %v3087_v23 = vadd.f32 %v3722_v11, %v1332_v8  ;;  %v1788_v8 = vld [vmem:[%s4144_s5 + $0x58] sm:$0xff] }
 0x62f   :  { %v1946_v52 = vmul.f32 -1.442695, %v3084_v5  ;;  %v1787_v5 = vld [vmem:[%s4144_s5 + $0x50] sm:$0xff] }
 0x630   :  { %v1947_v10 = vmul.f32 -1.442695, %v3087_v23  ;;  %v3040_v14 = vpack.c.bf16 %v1788_v8, %v1787_v5  ;;  %v1789_v23 = vld [vmem:[%s4144_s5 + $0x60] sm:$0xff] }
 0x631   :  { %3153 = vpow2.f32 %v1946_v52  ;;  %v1790_v52 = vld [vmem:[%s4144_s5 + $0x68] sm:$0xff] }
 0x632   :  { %3155 = vpow2.f32 %v1947_v10  ;;  %v3044_v10 = vpack.c.bf16 %v1790_v52, %v1789_v23 }
 0x63b   :  { %v3154_v59 = vpop.eup %3153 }
 0x63c   :  { %v1409_v54 = vadd.f32 1.0, %v3154_v59  ;;  %v3156_v61 = vpop.eup %3155  ;;  %v1791_v59 = vld [vmem:[%s4144_s5 + $0x70] sm:$0xff] }
 0x63d   :  { %v1416_v16 = vadd.f32 1.0, %v3156_v61 }
 0x63e   :  { %3157 = vrcp.f32 %v1409_v54  ;;  %v1792_v54 = vld [vmem:[%s4144_s5 + $0x78] sm:$0xff] }
 0x63f   :  { %3159 = vrcp.f32 %v1416_v16  ;;  %v3048_v61 = vpack.c.bf16 %v1792_v54, %v1791_v59 }
 0x648   :  { %v3158_v27 = vpop.eup %3157 }
 0x649   :  { %v1419_v31 = vmul.f32 %v3158_v27, %v1402_v13  ;;  %v3160_v12 = vpop.eup %3159 }
 0x64a   :  { %v1422_v22 = vsub.f32 1.0, %v3160_v12  ;;  %v1424_v57 = vmul.f32 %v3160_v12, %v3943_v51 }
 0x64b   :  { %v1420_v9 = vadd.f32 %v1419_v31, %v3739_v15 }
 0x64d   :  { %3161 = vtanh.f32 %v1420_v9 }
 0x657   :  { %v3162_v11 = vpop.eup %3161 }
 0x658   :  { %v1423_v44 = vmul.f32 %v3162_v11, %v1422_v22 }
 0x65a   :  { %v3991_v0 = vadd.f32 %v1424_v57, %v1423_v44 }
 0x65c   :  { %1948 = vst [vmem:[%s4143_s7 + $0x28] sm:$0xff] %v3991_v0  ;;  %1499 = vmatmul.mubr.f32.vlgmr.msra.gmra.mrb[12].mxu0 %v3991_v0  ;;  %2427 = vmatmul.mubr.f32.vlgmr.msra.gmra.mrb[36].mxu1 %v3991_v0 }
 0x65d   :  { %2967 = vmatpush1.bf16.msra.mxu0 %v3276_v18  ;;  %2998 = vmatpush3.bf16.msra.mxu1 %v3590_v19  ;;  %v1777_v18 = vld [vmem:[%s4144_s5] sm:$0xff] }
 0x65e   :  { %2969 = vmatprep.subr.bf16.mxu0 %v3298_v26  ;;  %2999 = vmatprep.subr.bf16.mxu1 %v4153_v3  ;;  %v1778_v26 = vld [vmem:[%s4144_s5 + $0x8] sm:$0xff] }
 0x65f   :  { %1668 = vmatprep.mubr.f32.mxu0 %v4154_v20  ;;  %2461 = vmatprep.mubr.msk.f32.mxu1 %vm3185_vm0, %v4154_v20 }
 0x661   :  { %2971 = vmatpush1.bf16.msra.mxu0 %v3309_v30  ;;  %3001 = vmatpush3.bf16.msra.mxu1 %v3603_v24  ;;  %v3020_v30 = vpack.c.bf16 %v1778_v26, %v1777_v18  ;;  %v4155_v18 = vld [vmem:[#allocation3_spill] sm:$0xff] }
 0x662   :  { %2973 = vmatprep.subr.bf16.mxu0 %v3321_v35  ;;  %3002 = vmatprep.subr.bf16.mxu1 %v4153_v3 }
 0x665   :  { %2975 = vmatpush1.bf16.msra.mxu0 %v3339_v42  ;;  %3004 = vmatpush3.bf16.msra.mxu1 %v3614_v28 }
 0x666   :  { %2977 = vmatprep.subr.bf16.mxu0 %v3351_v46  ;;  %3005 = vmatprep.subr.bf16.mxu1 %v4153_v3 }
 0x669   :  { %2979 = vmatpush1.bf16.msra.mxu0 %v3372_v55  ;;  %3007 = vmatpush3.bf16.msra.mxu1 %v3624_v33 }
 0x66a   :  { %2981 = vmatprep.subr.bf16.mxu0 %v3381_v58  ;;  %3008 = vmatprep.subr.bf16.mxu1 %v4153_v3 }
 0x66d   :  { %2983 = vmatpush1.bf16.msra.mxu0 %v3402_v4  ;;  %3010 = vmatpush3.bf16.msra.mxu1 %v3634_v38 }
 0x66e   :  { %2985 = vmatprep.subr.bf16.mxu0 %v3411_v7  ;;  %3011 = vmatprep.subr.bf16.mxu1 %v4153_v3 }
 0x671   :  { %2987 = vmatpush1.bf16.msra.mxu0 %v3432_v17  ;;  %3013 = vmatpush3.bf16.msra.mxu1 %v3646_v43 }
 0x672   :  { %2989 = vmatprep.subr.bf16.mxu0 %v3441_v21  ;;  %3014 = vmatprep.subr.bf16.mxu1 %v4153_v3 }
 0x675   :  { %2991 = vmatpush1.bf16.msra.mxu0 %v3462_v32  ;;  %3016 = vmatpush3.bf16.msra.mxu1 %v3656_v47 }
 0x676   :  { %2993 = vmatprep.subr.bf16.mxu0 %v3471_v36  ;;  %3017 = vmatprep.subr.bf16.mxu1 %v4153_v3 }
 0x679   :  { %2995 = vmatpush1.bf16.msra.mxu0 %v3480_v41  ;;  %3019 = vmatpush3.bf16.msra.mxu1 %v3666_v50  ;;  %v1779_v50 = vld [vmem:[%s4144_s5 + $0x10] sm:$0xff] }
 0x67a   :  { %3021 = vmatprep.subr.bf16.mxu0 %v3020_v30 }
 0x72f   :  { %v1500_v35 = vpop.f32.mrb[12].mxu0  ;;  %v1571_v42 = vpop.f32.mrb[36].mxu1 }
 0x730   :  { %v3090_v46 = vadd.f32 %v3725_v29, %v1500_v35  ;;  %v1502_v55 = vpop.f32.mrb[13].mxu0  ;;  %v2428_v58 = vpop.f32.mrb[37].mxu1  ;;  %v1572_v19 = vadd.f32 %v1571_v42, %v3748_v56  ;;  %v1780_v29 = vld [vmem:[%s4144_s5 + $0x18] sm:$0xff] }
 0x731   :  { %v3093_v4 = vadd.f32 %v3727_v37, %v1502_v55  ;;  %v3024_v20 = vpack.c.bf16 %v1780_v29, %v1779_v50 }
 0x732   :  { %v1949_v7 = vmul.f32 -1.442695, %v3090_v46 }
 0x733   :  { %v1950_v17 = vmul.f32 -1.442695, %v3093_v4 }
 0x734   :  { %3163 = vpow2.f32 %v1949_v7 }
 0x735   :  { %3165 = vpow2.f32 %v1950_v17 }
 0x73e   :  { %v3164_v21 = vpop.eup %3163 }
 0x73f   :  { %v1579_v32 = vadd.f32 1.0, %v3164_v21  ;;  %v3166_v36 = vpop.eup %3165 }
 0x740   :  { %v1586_v41 = vadd.f32 1.0, %v3166_v36 }
 0x741   :  { %3167 = vrcp.f32 %v1579_v32 }
 0x742   :  { %3169 = vrcp.f32 %v1586_v41 }
 0x74b   :  { %v3168_v24 = vpop.eup %3167 }
 0x74c   :  { %v1589_v28 = vmul.f32 %v3168_v24, %v1572_v19  ;;  %v3170_v38 = vpop.eup %3169 }
 0x74d   :  { %v1592_v43 = vsub.f32 1.0, %v3170_v38  ;;  %v1594_v15 = vmul.f32 %v3170_v38, %v3991_v0 }
 0x74e   :  { %v1590_v33 = vadd.f32 %v1589_v28, %v3745_v40  ;;  %v1781_v40 = vld [vmem:[%s4144_s5 + $0x20] sm:$0xff] }
 0x74f   :  { %v3028_v48 = vpack.c.bf16 %v1782_v34, %v1781_v40 }
 0x750   :  { %3171 = vtanh.f32 %v1590_v33 }
 0x75a   :  { %v3172_v47 = vpop.eup %3171 }
 0x75b   :  { %v1593_v37 = vmul.f32 %v3172_v47, %v1592_v43 }
 0x75d   :  { %v4049_v3 = vadd.f32 %v1594_v15, %v1593_v37 }
 0x75f   :  { %1951 = vst [vmem:[%s4143_s7 + $0x30] sm:$0xff] %v4049_v3  ;;  %1669 = vmatmul.mubr.f32.vlgmr.msra.gmra.mrb[14].mxu0 %v4049_v3  ;;  %2462 = vmatmul.mubr.f32.vlgmr.msra.gmra.mrb[38].mxu1 %v4049_v3 }
 0x760   :  { %3023 = vmatpush3.bf16.msra.mxu0 %v3020_v30  ;;  %2496 = vmatprep.mubr.f32.mxu0 %v3751_v63  ;;  %v1786_v63 = vld [vmem:[%s4144_s5 + $0x48] sm:$0xff] }
 0x761   :  { %3025 = vmatprep.subr.bf16.mxu0 %v3024_v20  ;;  %v3036_v39 = vpack.c.bf16 %v1786_v63, %v1785_v60 }
 0x764   :  { %3027 = vmatpush3.bf16.msra.mxu0 %v3024_v20 }
 0x765   :  { %3029 = vmatprep.subr.bf16.mxu0 %v3028_v48 }
 0x768   :  { %3031 = vmatpush3.bf16.msra.mxu0 %v3028_v48 }
 0x769   :  { %3033 = vmatprep.subr.bf16.mxu0 %v3032_v45 }
 0x76c   :  { %3035 = vmatpush3.bf16.msra.mxu0 %v3032_v45 }
 0x76d   :  { %3037 = vmatprep.subr.bf16.mxu0 %v3036_v39 }
 0x770   :  { %3039 = vmatpush3.bf16.msra.mxu0 %v3036_v39 }
 0x771   :  { %3041 = vmatprep.subr.bf16.mxu0 %v3040_v14 }
 0x774   :  { %3043 = vmatpush3.bf16.msra.mxu0 %v3040_v14 }
 0x775   :  { %3045 = vmatprep.subr.bf16.mxu0 %v3044_v10 }
 0x778   :  { %3047 = vmatpush3.bf16.msra.mxu0 %v3044_v10 }
 0x779   :  { %3049 = vmatprep.subr.bf16.mxu0 %v3048_v61 }
 0x77c   :  { %3051 = vmatpush3.bf16.msra.mxu0 %v3048_v61 }
 0x77f   :  { %2497 = vmatmul.mubr.f32.vlgmr.msra.gmra.mrb[16].mxu0 %v3799_v49 }
 0x780   :  { %2499 = vmatprep.mubr.f32.mxu0 %v3847_v6 }
 0x783   :  { %2500 = vmatmul.mubr.f32.gmra.mrb[18].mxu0 %v3895_v1 }
 0x784   :  { %2502 = vmatprep.mubr.f32.mxu0 %v3943_v51 }
 0x787   :  { %2503 = vmatmul.mubr.f32.gmra.mrb[20].mxu0 %v3991_v0 }
 0x788   :  { %2505 = vmatprep.mubr.f32.mxu0 %v4049_v3 }
 0x832   :  { %v1670_v16 = vpop.f32.mrb[14].mxu0  ;;  %v1741_v13 = vpop.f32.mrb[38].mxu1 }
 0x833   :  { %v3096_v27 = vadd.f32 %v3729_v53, %v1670_v16  ;;  %v1672_v31 = vpop.f32.mrb[15].mxu0  ;;  %v2463_v9 = vpop.f32.mrb[39].mxu1  ;;  %v1742_v44 = vadd.f32 %v1741_v13, %v3748_v56  ;;  %v1955_v53 = vld [vmem:[%s4145_s6] ss:$0 sm:$0xff] }
 0x834   :  { %v3099_v12 = vadd.f32 %v3731_v62, %v1672_v31 }
 0x835   :  { %v1952_v22 = vmul.f32 -1.442695, %v3096_v27 }
 0x836   :  { %v1953_v49 = vmul.f32 -1.442695, %v3099_v12 }
 0x837   :  { %3173 = vpow2.f32 %v1952_v22 }
 0x838   :  { %3175 = vpow2.f32 %v1953_v49 }
 0x841   :  { %v3174_v6 = vpop.eup %3173 }
 0x842   :  { %v1749_v1 = vadd.f32 1.0, %v3174_v6  ;;  %v3176_v51 = vpop.eup %3175 }
 0x843   :  { %v1756_v11 = vadd.f32 1.0, %v3176_v51 }
 0x844   :  { %3177 = vrcp.f32 %v1749_v1 }
 0x845   :  { %3179 = vrcp.f32 %v1756_v11 }
 0x84e   :  { %v3178_v57 = vpop.eup %3177 }
 0x84f   :  { %v1759_v0 = vmul.f32 %v3178_v57, %v1742_v44  ;;  %v3180_v4 = vpop.eup %3179 }
 0x850   :  { %v1762_v32 = vsub.f32 1.0, %v3180_v4  ;;  %v1764_v24 = vmul.f32 %v3180_v4, %v4049_v3 }
 0x851   :  { %v1760_v62 = vadd.f32 %v1759_v0, %v4155_v18 }
 0x852   :  { %v2498_v26 = vpop.f32.mrb[16].mxu0 }
 0x853   :  { %3181 = vtanh.f32 %v1760_v62  ;;  %v1872_v30 = vadd.f32 %v2498_v26, %v1955_v53  ;;  %v1866_v35 = vpop.f32.mrb[17].mxu0 }
 0x854   :  { %v1867_v42 = vadd.f32 %v1955_v53, %v1866_v35 }
 0x855   :  { %1906 = vst [vmem:[%s4146_s9 + $0x8] sm:$0xff] %v1872_v30 }
 0x856   :  { %1905 = vst [vmem:[%s4146_s9] sm:$0xff] %v1867_v42  ;;  %v2501_v56 = vpop.f32.mrb[18].mxu0 }
 0x857   :  { %v1882_v46 = vadd.f32 %v2501_v56, %v1955_v53  ;;  %v1876_v55 = vpop.f32.mrb[19].mxu0 }
 0x858   :  { %v1877_v58 = vadd.f32 %v1955_v53, %v1876_v55 }
 0x859   :  { %1908 = vst [vmem:[%s4146_s9 + $0x18] sm:$0xff] %v1882_v46 }
 0x85a   :  { %1907 = vst [vmem:[%s4146_s9 + $0x10] sm:$0xff] %v1877_v58  ;;  %v2504_v7 = vpop.f32.mrb[20].mxu0 }
 0x85b   :  { %v1892_v17 = vadd.f32 %v2504_v7, %v1955_v53  ;;  %v1886_v21 = vpop.f32.mrb[21].mxu0 }
 0x85c   :  { %v1887_v36 = vadd.f32 %v1955_v53, %v1886_v21 }
 0x85d   :  { %v3182_v41 = vpop.eup %3181  ;;  %1910 = vst [vmem:[%s4146_s9 + $0x28] sm:$0xff] %v1892_v17 }
 0x85e   :  { %v1763_v19 = vmul.f32 %v3182_v41, %v1762_v32  ;;  %1909 = vst [vmem:[%s4146_s9 + $0x20] sm:$0xff] %v1887_v36 }
 0x860   :  { %v1765_v28 = vadd.f32 %v1764_v24, %v1763_v19 }
 0x862   :  { %1954 = vst [vmem:[%s4143_s7 + $0x38] sm:$0xff] %v1765_v28  ;;  %1768 = vst [vmem:[%s4147_s8] sm:$0xff] %v1765_v28  ;;  %2506 = vmatmul.mubr.f32.gmra.mrb[22].mxu0 %v1765_v28 }
 0x935   :  { %v2507_v33 = vpop.f32.mrb[22].mxu0 }
 0x936   :  { %v1902_v38 = vadd.f32 %v2507_v33, %v1955_v53  ;;  %v1896_v43 = vpop.f32.mrb[23].mxu0 }
 0x937   :  { %v1897_v47 = vadd.f32 %v1955_v53, %v1896_v43 }
 0x938   :  { %1912 = vst [vmem:[%s4146_s9 + $0x38] sm:$0xff] %v1902_v38 }
 0x939   :  { %1911 = vst [vmem:[%s4146_s9 + $0x30] sm:$0xff] %v1897_v47 }

</bundles_post_ra>
